<compile_context>
chip_gen: v6e
topology: v6e:2x2x1
jax: 0.10.0
libtpu: 0.0.40
codegen_flags: <defaults>
</compile_context>

<pallas_src>
import functools

import jax
import jax.numpy as jnp
from jax.experimental import pallas as pl
from jax.experimental.pallas import tpu as pltpu


def _round_up(a, m):
    return (a + m - 1) // m * m


# ---------------------------------------------------------------------------
# Pallas kernel: fused fc1(+bn1)->relu->fc2(+bn2)->relu->fc3->log_softmax
# (BN already folded into w/b at parameter-packing time.)
# ---------------------------------------------------------------------------
def point_head_kernel(x_ref, w1_ref, b1_ref, w2_ref, b2_ref, w3_ref, b3_ref,
                      out_ref):
    # x arrives in f32 straight from HBM; cast to bf16 in VMEM (removes the
    # wrapper-side cast pass that doubled x HBM traffic).
    x = x_ref[...].astype(jnp.bfloat16)                            # (TB, 1024)

    # fc1 (+ folded bn1) + relu     (dropout1 == identity in eval)
    # TODO(synk): training-mode dropout (p=0.4 / p=0.5) would use pltpu.prng_*.
    h1 = jnp.dot(x, w1_ref[...], preferred_element_type=jnp.float32)
    h1 = jnp.maximum(h1 + b1_ref[...], 0.0).astype(jnp.bfloat16)   # (TB, 512)

    # fc2 (+ folded bn2) + relu     (dropout2 == identity in eval)
    h2 = jnp.dot(h1, w2_ref[...], preferred_element_type=jnp.float32)
    h2 = jnp.maximum(h2 + b2_ref[...], 0.0).astype(jnp.bfloat16)   # (TB, 256)

    # fc3 (class dim padded to a lane-dense 128; padded classes carry exactly
    # zero weight columns and a -1e30 bias => exp underflows to 0, so the
    # log_softmax over the real classes is unchanged). Keep this path f32.
    logits = jnp.dot(h2, w3_ref[...], preferred_element_type=jnp.float32)
    logits = logits + b3_ref[...]                              # (TB, NCP) f32

    # numerically stable log_softmax over the last axis
    m = jnp.max(logits, axis=-1, keepdims=True)
    z = logits - m
    lse = jnp.log(jnp.sum(jnp.exp(z), axis=-1, keepdims=True))
    out_ref[...] = (z - lse).astype(out_ref.dtype)


# ---------------------------------------------------------------------------
# One-time parameter packing: BN fold + transpose + bf16 cast + class padding
# ---------------------------------------------------------------------------
def pack_params(params, eps=1e-5):
    """Fold BatchNorm (eval) into fc weights/biases, transpose, cast, pad."""
    s1 = params["bn1_gamma"] / jnp.sqrt(params["bn1_var"] + eps)
    t1 = params["bn1_beta"] - params["bn1_mean"] * s1
    s2 = params["bn2_gamma"] / jnp.sqrt(params["bn2_var"] + eps)
    t2 = params["bn2_beta"] - params["bn2_mean"] * s2

    # PyTorch Linear weights are (out, in); fold BN scale per output channel,
    # then transpose so the kernel computes x @ W.
    w1 = (params["fc1_w"] * s1[:, None]).T.astype(jnp.bfloat16)    # (1024, 512)
    b1 = (params["fc1_b"] * s1 + t1)[None, :].astype(jnp.float32)  # (1, 512)
    w2 = (params["fc2_w"] * s2[:, None]).T.astype(jnp.bfloat16)    # (512, 256)
    b2 = (params["fc2_b"] * s2 + t2)[None, :].astype(jnp.float32)  # (1, 256)

    numclass = params["fc3_w"].shape[0]
    nc_pad = max(128, _round_up(numclass, 128))
    w3 = params["fc3_w"].T                                          # (256, NC)
    w3 = jnp.pad(w3, ((0, 0), (0, nc_pad - numclass))).astype(jnp.bfloat16)
    # Padded classes get a huge-negative (finite) f32 bias => exp() == 0.
    b3 = jnp.pad(params["fc3_b"], (0, nc_pad - numclass),
                 constant_values=-1e30)[None, :].astype(jnp.float32)

    return {"w1": w1, "b1": b1, "w2": w2, "b2": b2, "w3": w3, "b3": b3,
            "numclass": numclass}


# ---------------------------------------------------------------------------
# Tile-size heuristic: big tiles to amortize per-step overhead, but keep >=4
# grid steps when the batch allows it so v7x's two TensorCores both get work.
# ---------------------------------------------------------------------------
def _choose_tile_b(B, max_tile_b=1024, min_tile_b=256, target_steps=4):
    Bp = _round_up(max(B, 8), 8)
    tb = _round_up(min(max_tile_b, Bp), 8)
    while pl.cdiv(Bp, tb) < target_steps and tb // 2 >= min_tile_b:
        tb = _round_up(tb // 2, 8)
    return tb


# ---------------------------------------------------------------------------
# Forward wrapper: batch grid, VMEM-resident weights, lane-dense output
# ---------------------------------------------------------------------------
@functools.partial(jax.jit, static_argnames=("tile_b", "numclass"))
def _point_head_call(x, w1, b1, w2, b2, w3, b3, *, tile_b, numclass):
    B = x.shape[0]
    # Only align the batch to the 8-sublane granule (<=7 rows, usually 0);
    # uneven tile division is handled by a pl.cdiv grid with a masked last tile.
    Bp = _round_up(max(B, 8), 8)
    if Bp != B:
        x = jnp.pad(x, ((0, Bp - B), (0, 0)))

    nc_pad = w3.shape[1]
    const2 = lambda i: (0, 0)   # weights: same block every step -> VMEM-resident

    out = pl.pallas_call(
        point_head_kernel,
        out_shape=jax.ShapeDtypeStruct((Bp, nc_pad), jnp.float32),
        grid=(pl.cdiv(Bp, tile_b),),
        in_specs=[
            pl.BlockSpec((tile_b, 1024), lambda i: (i, 0)),   # x (pipelined)
            pl.BlockSpec((1024, 512), const2),
            pl.BlockSpec((1, 512), const2),
            pl.BlockSpec((512, 256), const2),
            pl.BlockSpec((1, 256), const2),
            pl.BlockSpec((256, nc_pad), const2),
            pl.BlockSpec((1, nc_pad), const2),
        ],
        out_specs=pl.BlockSpec((tile_b, nc_pad), lambda i: (i, 0)),
        compiler_params=pltpu.CompilerParams(
            dimension_semantics=("parallel",),
            # ~19 MiB footprint at tile_b=1024 (f32 x tiles + intermediates);
            # raise above v5e's 16 MiB default, still within v7x's 64 MiB VMEM.
            vmem_limit_bytes=32 * 1024 * 1024,
        ),
    )(x, w1, b1, w2, b2, w3, b3)

    # Remove batch/class padding under the same jit (single fused copy).
    return out[:B, :numclass]


def point_network_forward(x, packed, *, max_tile_b=1024):
    """x: (B, 1024) f32 backbone features. Returns (B, numclass) f32 log-probs."""
    tb = _choose_tile_b(x.shape[0], max_tile_b)
    return _point_head_call(x, packed["w1"], packed["b1"],
                            packed["w2"], packed["b2"],
                            packed["w3"], packed["b3"],
                            tile_b=tb, numclass=packed["numclass"])


# ---------------------------------------------------------------------------
# Pure-JAX f32 reference (matches the PyTorch eval-mode forward)
# ---------------------------------------------------------------------------
def reference_forward(x, params, eps=1e-5):
    h = x @ params["fc1_w"].T + params["fc1_b"]
    h = ((h - params["bn1_mean"]) / jnp.sqrt(params["bn1_var"] + eps)
         * params["bn1_gamma"] + params["bn1_beta"])
    h = jnp.maximum(h, 0.0)
    h = h @ params["fc2_w"].T + params["fc2_b"]
    h = ((h - params["bn2_mean"]) / jnp.sqrt(params["bn2_var"] + eps)
         * params["bn2_gamma"] + params["bn2_beta"])
    h = jnp.maximum(h, 0.0)
    logits = h @ params["fc3_w"].T + params["fc3_b"]
    return jax.nn.log_softmax(logits, axis=-1)


# ---------------------------------------------------------------------------
# Deterministic parameter construction (synthetic, matching __init__ shapes)
# ---------------------------------------------------------------------------
def make_params(numclass, key):
    ks = jax.random.split(key, 9)
    return {
        "fc1_w": 0.02 * jax.random.normal(ks[0], (512, 1024), jnp.float32),
        "fc1_b": 0.01 * jax.random.normal(ks[1], (512,), jnp.float32),
        "fc2_w": 0.02 * jax.random.normal(ks[2], (256, 512), jnp.float32),
        "fc2_b": 0.01 * jax.random.normal(ks[3], (256,), jnp.float32),
        "fc3_w": 0.02 * jax.random.normal(ks[4], (numclass, 256), jnp.float32),
        "fc3_b": 0.01 * jax.random.normal(ks[5], (numclass,), jnp.float32),
        # BatchNorm1d(512)
        "bn1_gamma": 1.0 + 0.1 * jax.random.normal(ks[6], (512,), jnp.float32),
        "bn1_beta": jnp.zeros((512,), jnp.float32),
        "bn1_mean": 0.05 * jax.random.normal(ks[7], (512,), jnp.float32),
        "bn1_var": jnp.ones((512,), jnp.float32),
        # BatchNorm1d(256)
        "bn2_gamma": jnp.ones((256,), jnp.float32),
        "bn2_beta": 0.01 * jax.random.normal(ks[8], (256,), jnp.float32),
        "bn2_mean": jnp.zeros((256,), jnp.float32),
        "bn2_var": jnp.ones((256,), jnp.float32),
    }


if __name__ == "__main__":
    key = jax.random.PRNGKey(0)
    k_param, k_x = jax.random.split(key)

    numclass = 40   # e.g. ModelNet40-style class count
    B = 8           # small batch

    params = make_params(numclass, k_param)
    packed = pack_params(params)      # one-time BN fold / transpose / cast / pad

    # TODO(synk): `self.feature(input)` is an externally supplied point-cloud
    # feature extractor; we feed its (B, 1024) output directly.
    x = jax.random.normal(k_x, (B, 1024), jnp.float32)

    out = point_network_forward(x, packed)
    out = jax.block_until_ready(out)

    assert out.shape == (B, numclass)

    # log-probs sum (in prob space) to ~1 per row
    probs_sum = jnp.sum(jnp.exp(out), axis=-1)
    assert jnp.allclose(probs_sum, 1.0, atol=1e-3), probs_sum

    # tolerance check vs. the f32 reference (bf16 weights/activations)
    ref = reference_forward(x, params)
    assert jnp.allclose(out, ref, atol=5e-2, rtol=5e-2), \
        float(jnp.max(jnp.abs(out - ref)))

    print("KERNEL_OK")
</pallas_src>

<mosaic_0001>
module attributes {stable_mosaic.version = 11 : i64} {
  func.func @point_head_kernel(%arg0: i32, %arg1: memref<8x1024xf32, #tpu.memory_space<vmem>>, %arg2: memref<1024x512xbf16, #tpu.memory_space<vmem>>, %arg3: memref<1x512xf32, #tpu.memory_space<vmem>>, %arg4: memref<512x256xbf16, #tpu.memory_space<vmem>>, %arg5: memref<1x256xf32, #tpu.memory_space<vmem>>, %arg6: memref<256x128xbf16, #tpu.memory_space<vmem>>, %arg7: memref<1x128xf32, #tpu.memory_space<vmem>>, %arg8: memref<8x128xf32, #tpu.memory_space<vmem>>) attributes {dimension_semantics = [#tpu.dimension_semantics<parallel>], iteration_bounds = array<i64: 1>, scalar_prefetch = 0 : i64, scratch_operands = 0 : i64, tpu.core_type = #tpu.core_type<tc>, window_params = [{transform_indices = @transform_0, window_bounds = array<i64: 8, 1024>}, {pipeline_mode = #tpu.pipeline_mode<synchronous>, transform_indices = @transform_1, window_bounds = array<i64: 1024, 512>}, {pipeline_mode = #tpu.pipeline_mode<synchronous>, transform_indices = @transform_2, window_bounds = array<i64: 1, 512>}, {pipeline_mode = #tpu.pipeline_mode<synchronous>, transform_indices = @transform_3, window_bounds = array<i64: 512, 256>}, {pipeline_mode = #tpu.pipeline_mode<synchronous>, transform_indices = @transform_4, window_bounds = array<i64: 1, 256>}, {pipeline_mode = #tpu.pipeline_mode<synchronous>, transform_indices = @transform_5, window_bounds = array<i64: 256, 128>}, {pipeline_mode = #tpu.pipeline_mode<synchronous>, transform_indices = @transform_6, window_bounds = array<i64: 1, 128>}, {transform_indices = @transform_7, window_bounds = array<i64: 8, 128>}]} {
    %c0 = arith.constant 0 : index
    %c0_0 = arith.constant 0 : index
    %0 = vector.load %arg1[%c0, %c0_0] : memref<8x1024xf32, #tpu.memory_space<vmem>>, vector<8x1024xf32>
    %1 = arith.truncf %0 : vector<8x1024xf32> to vector<8x1024xbf16>
    %c0_1 = arith.constant 0 : index
    %c0_2 = arith.constant 0 : index
    %2 = vector.load %arg2[%c0_1, %c0_2] : memref<1024x512xbf16, #tpu.memory_space<vmem>>, vector<1024x512xbf16>
    %cst = arith.constant dense<0.000000e+00> : vector<8x512xf32>
    %3 = tpu.matmul %1, %2, %cst {dimension_numbers = #tpu.dot_dimension_numbers<[1], [0], [0], [1], [0, 0, 1, 1], [], []>} : vector<8x1024xbf16>, vector<1024x512xbf16>, vector<8x512xf32> -> vector<8x512xf32>
    %c0_3 = arith.constant 0 : index
    %c0_4 = arith.constant 0 : index
    %4 = vector.load %arg3[%c0_3, %c0_4] : memref<1x512xf32, #tpu.memory_space<vmem>>, vector<1x512xf32>
    %5 = vector.broadcast %4 : vector<1x512xf32> to vector<8x512xf32>
    %6 = arith.addf %3, %5 : vector<8x512xf32>
    %cst_5 = arith.constant 0.000000e+00 : f32
    %7 = vector.broadcast %cst_5 : f32 to vector<8x512xf32>
    %8 = arith.maximumf %6, %7 : vector<8x512xf32>
    %9 = arith.truncf %8 : vector<8x512xf32> to vector<8x512xbf16>
    %c0_6 = arith.constant 0 : index
    %c0_7 = arith.constant 0 : index
    %10 = vector.load %arg4[%c0_6, %c0_7] : memref<512x256xbf16, #tpu.memory_space<vmem>>, vector<512x256xbf16>
    %cst_8 = arith.constant dense<0.000000e+00> : vector<8x256xf32>
    %11 = tpu.matmul %9, %10, %cst_8 {dimension_numbers = #tpu.dot_dimension_numbers<[1], [0], [0], [1], [0, 0, 1, 1], [], []>} : vector<8x512xbf16>, vector<512x256xbf16>, vector<8x256xf32> -> vector<8x256xf32>
    %c0_9 = arith.constant 0 : index
    %c0_10 = arith.constant 0 : index
    %12 = vector.load %arg5[%c0_9, %c0_10] : memref<1x256xf32, #tpu.memory_space<vmem>>, vector<1x256xf32>
    %13 = vector.broadcast %12 : vector<1x256xf32> to vector<8x256xf32>
    %14 = arith.addf %11, %13 : vector<8x256xf32>
    %cst_11 = arith.constant 0.000000e+00 : f32
    %15 = vector.broadcast %cst_11 : f32 to vector<8x256xf32>
    %16 = arith.maximumf %14, %15 : vector<8x256xf32>
    %17 = arith.truncf %16 : vector<8x256xf32> to vector<8x256xbf16>
    %c0_12 = arith.constant 0 : index
    %c0_13 = arith.constant 0 : index
    %18 = vector.load %arg6[%c0_12, %c0_13] : memref<256x128xbf16, #tpu.memory_space<vmem>>, vector<256x128xbf16>
    %cst_14 = arith.constant dense<0.000000e+00> : vector<8x128xf32>
    %19 = tpu.matmul %17, %18, %cst_14 {dimension_numbers = #tpu.dot_dimension_numbers<[1], [0], [0], [1], [0, 0, 1, 1], [], []>} : vector<8x256xbf16>, vector<256x128xbf16>, vector<8x128xf32> -> vector<8x128xf32>
    %c0_15 = arith.constant 0 : index
    %c0_16 = arith.constant 0 : index
    %20 = vector.load %arg7[%c0_15, %c0_16] : memref<1x128xf32, #tpu.memory_space<vmem>>, vector<1x128xf32>
    %21 = vector.broadcast %20 : vector<1x128xf32> to vector<8x128xf32>
    %22 = arith.addf %19, %21 : vector<8x128xf32>
    %cst_17 = arith.constant dense<0xFF800000> : vector<8xf32>
    %23 = vector.multi_reduction <maximumf>, %22, %cst_17 [1] : vector<8x128xf32> to vector<8xf32>
    %24 = vector.shape_cast %23 : vector<8xf32> to vector<8x1xf32>
    %25 = vector.broadcast %24 : vector<8x1xf32> to vector<8x128xf32>
    %26 = arith.subf %22, %25 : vector<8x128xf32>
    %27 = math.exp %26 : vector<8x128xf32>
    %cst_18 = arith.constant dense<0.000000e+00> : vector<8xf32>
    %28 = vector.multi_reduction <add>, %27, %cst_18 [1] : vector<8x128xf32> to vector<8xf32>
    %29 = vector.shape_cast %28 : vector<8xf32> to vector<8x1xf32>
    %30 = math.log %29 : vector<8x1xf32>
    %31 = vector.broadcast %30 : vector<8x1xf32> to vector<8x128xf32>
    %32 = arith.subf %26, %31 : vector<8x128xf32>
    %c0_19 = arith.constant 0 : index
    %c0_20 = arith.constant 0 : index
    %33 = vector.load %arg8[%c0_19, %c0_20] : memref<8x128xf32, #tpu.memory_space<vmem>>, vector<8x128xf32>
    tpu.vector_store %arg8[%c0_19, %c0_20], %32 {strides = array<i32>} : memref<8x128xf32, #tpu.memory_space<vmem>>, vector<8x128xf32>,
    return
  }
  func.func @transform_0(%arg0: i32) -> (i32, i32) {
    %c0_i32 = arith.constant 0 : i32
    %c0_i32_0 = arith.constant 0 : i32
    return %arg0, %c0_i32 : i32, i32
  }
  func.func @transform_1(%arg0: i32) -> (i32, i32) {
    %c0_i32 = arith.constant 0 : i32
    %c0_i32_0 = arith.constant 0 : i32
    %c0_i32_1 = arith.constant 0 : i32
    return %c0_i32, %c0_i32_0 : i32, i32
  }
  func.func @transform_2(%arg0: i32) -> (i32, i32) {
    %c0_i32 = arith.constant 0 : i32
    %c0_i32_0 = arith.constant 0 : i32
    %c0_i32_1 = arith.constant 0 : i32
    return %c0_i32, %c0_i32_0 : i32, i32
  }
  func.func @transform_3(%arg0: i32) -> (i32, i32) {
    %c0_i32 = arith.constant 0 : i32
    %c0_i32_0 = arith.constant 0 : i32
    %c0_i32_1 = arith.constant 0 : i32
    return %c0_i32, %c0_i32_0 : i32, i32
  }
  func.func @transform_4(%arg0: i32) -> (i32, i32) {
    %c0_i32 = arith.constant 0 : i32
    %c0_i32_0 = arith.constant 0 : i32
    %c0_i32_1 = arith.constant 0 : i32
    return %c0_i32, %c0_i32_0 : i32, i32
  }
  func.func @transform_5(%arg0: i32) -> (i32, i32) {
    %c0_i32 = arith.constant 0 : i32
    %c0_i32_0 = arith.constant 0 : i32
    %c0_i32_1 = arith.constant 0 : i32
    return %c0_i32, %c0_i32_0 : i32, i32
  }
  func.func @transform_6(%arg0: i32) -> (i32, i32) {
    %c0_i32 = arith.constant 0 : i32
    %c0_i32_0 = arith.constant 0 : i32
    %c0_i32_1 = arith.constant 0 : i32
    return %c0_i32, %c0_i32_0 : i32, i32
  }
  func.func @transform_7(%arg0: i32) -> (i32, i32) {
    %c0_i32 = arith.constant 0 : i32
    %c0_i32_0 = arith.constant 0 : i32
    return %arg0, %c0_i32 : i32, i32
  }
}

</mosaic_0001>

<bundles_post_ra>
// kernel: _point_head_call.1
= control target key start
LH: loop header
LB: loop body
LE: loop exit
PB: predicated region body
PF: predicated region fallthrough
CT: control target
= control target key end

     0   :  { %12 = vsyncpa [#allocation3], 0  ;;  %s3826_s0 = inlined_call_operand.hbm [shape: f32[8,1024], index: 0, kind: input, shape index: {}]   ;;  %s3827_s1 = inlined_call_operand.hbm [shape: bf16[1024,512], index: 1, kind: input, shape index: {}]   ;;  %s3828_s2 = inlined_call_operand.hbm [shape: f32[1,512], index: 2, kind: input, shape index: {}]   ;;  %s3829_s3 = inlined_call_operand.hbm [shape: bf16[512,256], index: 3, kind: input, shape index: {}]   ;;  %s3830_s4 = inlined_call_operand.vmem [shape: f32[1,256], index: 4, kind: input, shape index: {}]   ;;  %s3831_s5 = inlined_call_operand.hbm [shape: bf16[256,128], index: 5, kind: input, shape index: {}]   ;;  %s3832_s6 = inlined_call_operand.vmem [shape: f32[1,128], index: 6, kind: input, shape index: {}]   ;;  %s3833_s7 = inlined_call_operand.hbm [shape: f32[8,128], index: 7, kind: output, shape index: {}]  }
   0x1   :  { %13 = vsyncpa [#allocation6], 0 }
   0x2   :  { %14 = vsyncpa [#allocation9], 0 }
   0x3   :  { %15 = vsyncpa [#allocation4], 0  ;;  %s3686_s24 = smov [#allocation5]  }
   0x4   :  { %s31_s25 = sshll.u32 %s3686_s24, 4  ;;  %s32_s25 = int_to_ptr.vmem [resolvable:$true] %s31_s25 }
   0x5   :  { %s3566_s26 = scalar_lea.vmem %s32_s25, 32768  ;;  %p3571_p1 = scmp.lt.s32.totalorder %s32_s25, %s32_s25 }
   0x6   :  { %p3567_p0 = scmp.ne.s32.totalorder %s32_s25, %s3566_s26  ;;  %p3572_p2 = scmp.lt.s32.totalorder %s3566_s26, %s3566_s26 }
   0x8   :  { %p3573_p3 = por %p3572_p2, %p3571_p1 }
   0xa   :  { %p3574_p4 = pnand %p3573_p3, %p3567_p0 }
   0xc   :  { %3577 = shalt.err (!%p3574_p4)
}
   0xd   :  { %s3687_s27 = smov 256   ;;  %s3688_s28 = smov 16  }
   0xe   :  { %37 = dma.hbm_to_vmem [thread:$0]  %s3827_s1, 32768, %s32_s25, [#allocation6], %s3687_s27, %s3687_s27, %s3688_s28  }
   0xf   :  { %s3689_s8 = smov [#allocation8]  }
  0x10   :  { %s53_s9 = sshll.u32 %s3689_s8, 4  ;;  %s54_s9 = int_to_ptr.vmem [resolvable:$true] %s53_s9 }
  0x11   :  { %s3586_s10 = scalar_lea.vmem %s54_s9, 8192  ;;  %p3591_p6 = scmp.lt.s32.totalorder %s54_s9, %s54_s9 }
  0x12   :  { %p3587_p5 = scmp.ne.s32.totalorder %s54_s9, %s3586_s10  ;;  %p3592_p7 = scmp.lt.s32.totalorder %s3586_s10, %s3586_s10 }
  0x14   :  { %p3593_p8 = por %p3592_p7, %p3591_p6 }
  0x16   :  { %p3594_p9 = pnand %p3593_p8, %p3587_p5 }
  0x18   :  { %3597 = shalt.err (!%p3594_p9)
}
  0x19   :  { %s3690_s11 = smov 128   ;;  %s3691_s12 = smov 8  }
  0x1a   :  { %59 = dma.hbm_to_vmem [thread:$0]  %s3829_s3, 8192, %s54_s9, [#allocation9], %s3690_s11, %s3690_s11, %s3691_s12  }
  0x1b   :  { %s3692_s15 = smov [#allocation2]   ;;  %s3693_s17 = smov [#allocation7]  }
  0x1c   :  { %s22_s16 = sshll.u32 %s3692_s15, 4  ;;  %s44_s1 = sshll.u32 %s3693_s17, 4  ;;  %s23_s16 = int_to_ptr.vmem [resolvable:$true] %s22_s16  ;;  %s45_s1 = int_to_ptr.vmem [resolvable:$true] %s44_s1 }
  0x1d   :  { %s3606_s18 = scalar_lea.vmem %s23_s16, 1024  ;;  %p3611_p11 = scmp.lt.s32.totalorder %s23_s16, %s23_s16 }
  0x1e   :  { %p3607_p10 = scmp.ne.s32.totalorder %s23_s16, %s3606_s18  ;;  %p3612_p12 = scmp.lt.s32.totalorder %s3606_s18, %s3606_s18 }
  0x20   :  { %p3613_p13 = por %p3612_p12, %p3611_p11 }
  0x22   :  { %p3614_p0 = pnand %p3613_p13, %p3607_p10 }
  0x24   :  { %3617 = shalt.err (!%p3614_p0)
}
  0x25   :  { %25 = dma.hbm_to_vmem [thread:$0]  %s3826_s0, 1024, %s23_s16, [#allocation3]  }
  0x26   :  { %s3626_s21 = scalar_lea.vmem %s45_s1, 64  ;;  %p3631_p2 = scmp.lt.s32.totalorder %s45_s1, %s45_s1 }
  0x27   :  { %p3627_p1 = scmp.ne.s32.totalorder %s45_s1, %s3626_s21  ;;  %p3632_p3 = scmp.lt.s32.totalorder %s3626_s21, %s3626_s21 }
  0x29   :  { %p3633_p4 = por %p3632_p3, %p3631_p2 }
  0x2b   :  { %p3634_p5 = pnand %p3633_p4, %p3627_p1 }
  0x2d   :  { %3637 = shalt.err (!%p3634_p5)
}
  0x2e   :  { %47 = dma.hbm_to_vmem [thread:$0]  %s3828_s2, 64, %s45_s1, [#allocation6]  }
  0x2f   :  { %s3694_s23 = smov [#allocation10]  }
  0x30   :  { %s67_s24 = sshll.u32 %s3694_s23, 4  ;;  %s68_s24 = int_to_ptr.vmem [resolvable:$true] %s67_s24 }
  0x31   :  { %s3646_s25 = scalar_lea.vmem %s68_s24, 2048  ;;  %p3651_p7 = scmp.lt.s32.totalorder %s68_s24, %s68_s24 }
  0x32   :  { %p3647_p6 = scmp.ne.s32.totalorder %s68_s24, %s3646_s25  ;;  %p3652_p8 = scmp.lt.s32.totalorder %s3646_s25, %s3646_s25 }
  0x34   :  { %p3653_p9 = por %p3652_p8, %p3651_p7 }
  0x36   :  { %p3654_p10 = pnand %p3653_p9, %p3647_p6 }
  0x38   :  { %3657 = shalt.err (!%p3654_p10)
}
  0x39   :  { %s3695_s0 = smov 64   ;;  %s3696_s26 = smov 4  }
  0x3a   :  { %73 = dma.hbm_to_vmem [thread:$0]  %s3831_s5, 2048, %s68_s24, [#allocation9], %s3695_s0, %s3695_s0, %s3696_s26  }
  0x3b   :  { %3678 = dma.done.wait [#allocation3], 1024  }
  0x3c   :  { %3679 = vsyncadd [#allocation3], 4294966272 }
  0x3d   :  { %3680 = dma.done.wait [#allocation6], 32832  }
  0x3e   :  { %3681 = vsyncadd [#allocation6], 4294934464 }
  0x3f   :  { %3682 = dma.done.wait [#allocation9], 10240  }
  0x40   :  { %3683 = vsyncadd [#allocation9], 4294957056  ;;  %v3058_v0 = vld [vmem:[#allocation5 + $0xe4] ss:$16 sps:$4 sm:$0xff]   ;;  %v3062_v2 = vld [vmem:[#allocation5 + $0xe0] ss:$16 sps:$4 sm:$0xff]  }
  0x41   :  { %v3060_v1 = vld [vmem:[#allocation5 + $0x2e4] ss:$16 sps:$4 sm:$0xff]   ;;  %1666 = vmatprep.subr.bf16.mxu0 %v3058_v0  ;;  %v3063_v3 = vld [vmem:[#allocation5 + $0x2e0] ss:$16 sps:$4 sm:$0xff]   ;;  %v93_v46 = vld [vmem:[#allocation2 + $0x8] sm:$0xff]  ;;  %s3697_s30 = smov [#allocation11]  }
  0x42   :  { %1707 = vmatprep.subr.bf16.mxu1 %v3060_v1  ;;  %v3064_v4 = vld [vmem:[#allocation5 + $0xc4] ss:$16 sps:$4 sm:$0xff]   ;;  %1667 = vmatpush1.bf16.msra.mxu0 %v3062_v2  ;;  %v3068_v6 = vld [vmem:[#allocation5 + $0xc0] ss:$16 sps:$4 sm:$0xff]   ;;  %v3753_v49 = vpack.c.bf16 %v93_v46, %v93_v46  ;;  %v95_v50 = vld [vmem:[#allocation2 + $0x18] sm:$0xff]  ;;  %s2676_s8 = sshll.u32 %s3697_s30, 4  ;;  %s2677_s8 = int_to_ptr.vmem [resolvable:$true] %s2676_s8 }
  0x43   :  { %1708 = vmatpush1.bf16.msra.mxu1 %v3063_v3  ;;  %v3066_v5 = vld [vmem:[#allocation5 + $0x2c4] ss:$16 sps:$4 sm:$0xff]   ;;  %1668 = vmatprep.subr.bf16.mxu0 %v3064_v4  ;;  %v3069_v7 = vld [vmem:[#allocation5 + $0x2c0] ss:$16 sps:$4 sm:$0xff]   ;;  %v3755_v52 = vpack.c.bf16 %v95_v50, %v95_v50  ;;  %p3663_p12 = scmp.lt.s32.totalorder %s2677_s8, %s2677_s8 }
  0x44   :  { %1709 = vmatprep.subr.bf16.mxu1 %v3066_v5  ;;  %v3070_v8 = vld [vmem:[#allocation5 + $0xa4] ss:$16 sps:$4 sm:$0xff]   ;;  %v3074_v10 = vld [vmem:[#allocation5 + $0xa0] ss:$16 sps:$4 sm:$0xff]   ;;  %1698 = vmatprep.mubr.bf16.mxu0 %v3753_v49 }
  0x45   :  { %v3072_v9 = vld [vmem:[#allocation5 + $0x2a4] ss:$16 sps:$4 sm:$0xff]   ;;  %v3075_v11 = vld [vmem:[#allocation5 + $0x2a0] ss:$16 sps:$4 sm:$0xff]   ;;  %1739 = vmatprep.mubr.bf16.mxu1 %v3755_v52 }
  0x46   :  { %1669 = vmatpush1.bf16.msra.mxu0 %v3068_v6  ;;  %v3076_v12 = vld [vmem:[#allocation5 + $0x84] ss:$16 sps:$4 sm:$0xff]   ;;  %v3080_v14 = vld [vmem:[#allocation5 + $0x80] ss:$16 sps:$4 sm:$0xff]  }
  0x47   :  { %1710 = vmatpush1.bf16.msra.mxu1 %v3069_v7  ;;  %1670 = vmatprep.subr.bf16.mxu0 %v3070_v8  ;;  %v3078_v13 = vld [vmem:[#allocation5 + $0x284] ss:$16 sps:$4 sm:$0xff]   ;;  %v3081_v15 = vld [vmem:[#allocation5 + $0x280] ss:$16 sps:$4 sm:$0xff]  }
  0x48   :  { %1711 = vmatprep.subr.bf16.mxu1 %v3072_v9  ;;  %v3082_v16 = vld [vmem:[#allocation5 + $0x64] ss:$16 sps:$4 sm:$0xff]   ;;  %v3086_v18 = vld [vmem:[#allocation5 + $0x60] ss:$16 sps:$4 sm:$0xff]  }
  0x49   :  { %v3084_v17 = vld [vmem:[#allocation5 + $0x264] ss:$16 sps:$4 sm:$0xff]   ;;  %v3087_v19 = vld [vmem:[#allocation5 + $0x260] ss:$16 sps:$4 sm:$0xff]  }
  0x4a   :  { %1671 = vmatpush1.bf16.msra.mxu0 %v3074_v10  ;;  %v3088_v20 = vld [vmem:[#allocation5 + $0x44] ss:$16 sps:$4 sm:$0xff]   ;;  %v3092_v22 = vld [vmem:[#allocation5 + $0x40] ss:$16 sps:$4 sm:$0xff]  }
  0x4b   :  { %1712 = vmatpush1.bf16.msra.mxu1 %v3075_v11  ;;  %1672 = vmatprep.subr.bf16.mxu0 %v3076_v12  ;;  %v3090_v21 = vld [vmem:[#allocation5 + $0x244] ss:$16 sps:$4 sm:$0xff]   ;;  %v3093_v23 = vld [vmem:[#allocation5 + $0x240] ss:$16 sps:$4 sm:$0xff]  }
  0x4c   :  { %1713 = vmatprep.subr.bf16.mxu1 %v3078_v13  ;;  %v3094_v24 = vld [vmem:[#allocation5 + $0x24] ss:$16 sps:$4 sm:$0xff]   ;;  %v3098_v26 = vld [vmem:[#allocation5 + $0x20] ss:$16 sps:$4 sm:$0xff]  }
  0x4d   :  { %v3096_v25 = vld [vmem:[#allocation5 + $0x224] ss:$16 sps:$4 sm:$0xff]   ;;  %v3099_v27 = vld [vmem:[#allocation5 + $0x220] ss:$16 sps:$4 sm:$0xff]  }
  0x4e   :  { %1673 = vmatpush1.bf16.msra.mxu0 %v3080_v14  ;;  %v3100_v28 = vld [vmem:[#allocation5 + $0x4] ss:$16 sps:$4 sm:$0xff]   ;;  %v3104_v30 = vld [vmem:[#allocation5] ss:$16 sps:$4 sm:$0xff]  }
  0x4f   :  { %1714 = vmatpush1.bf16.msra.mxu1 %v3081_v15  ;;  %1674 = vmatprep.subr.bf16.mxu0 %v3082_v16  ;;  %v3102_v29 = vld [vmem:[#allocation5 + $0x204] ss:$16 sps:$4 sm:$0xff]   ;;  %v3105_v31 = vld [vmem:[#allocation5 + $0x200] ss:$16 sps:$4 sm:$0xff]  }
  0x50   :  { %1715 = vmatprep.subr.bf16.mxu1 %v3084_v17  ;;  %v3106_v32 = vld [vmem:[#allocation5 + $0x1e4] ss:$16 sps:$4 sm:$0xff]   ;;  %v3110_v34 = vld [vmem:[#allocation5 + $0x1e0] ss:$16 sps:$4 sm:$0xff]  }
  0x51   :  { %v3108_v33 = vld [vmem:[#allocation5 + $0x3e4] ss:$16 sps:$4 sm:$0xff]   ;;  %v3111_v35 = vld [vmem:[#allocation5 + $0x3e0] ss:$16 sps:$4 sm:$0xff]  }
  0x52   :  { %1675 = vmatpush1.bf16.msra.mxu0 %v3086_v18  ;;  %v3112_v36 = vld [vmem:[#allocation5 + $0x1c4] ss:$16 sps:$4 sm:$0xff]   ;;  %v3116_v38 = vld [vmem:[#allocation5 + $0x1c0] ss:$16 sps:$4 sm:$0xff]  }
  0x53   :  { %1716 = vmatpush1.bf16.msra.mxu1 %v3087_v19  ;;  %1676 = vmatprep.subr.bf16.mxu0 %v3088_v20  ;;  %v3114_v37 = vld [vmem:[#allocation5 + $0x3c4] ss:$16 sps:$4 sm:$0xff]   ;;  %v3117_v39 = vld [vmem:[#allocation5 + $0x3c0] ss:$16 sps:$4 sm:$0xff]  }
  0x54   :  { %1717 = vmatprep.subr.bf16.mxu1 %v3090_v21  ;;  %v3118_v40 = vld [vmem:[#allocation5 + $0x1a4] ss:$16 sps:$4 sm:$0xff]   ;;  %v3122_v42 = vld [vmem:[#allocation5 + $0x1a0] ss:$16 sps:$4 sm:$0xff]  }
  0x55   :  { %v3120_v41 = vld [vmem:[#allocation5 + $0x3a4] ss:$16 sps:$4 sm:$0xff]   ;;  %v3123_v43 = vld [vmem:[#allocation5 + $0x3a0] ss:$16 sps:$4 sm:$0xff]  }
  0x56   :  { %1677 = vmatpush1.bf16.msra.mxu0 %v3092_v22  ;;  %v3124_v44 = vld [vmem:[#allocation5 + $0x184] ss:$16 sps:$4 sm:$0xff]   ;;  %v3128_v47 = vld [vmem:[#allocation5 + $0x180] ss:$16 sps:$4 sm:$0xff]  }
  0x57   :  { %1718 = vmatpush1.bf16.msra.mxu1 %v3093_v23  ;;  %1678 = vmatprep.subr.bf16.mxu0 %v3094_v24  ;;  %v3126_v45 = vld [vmem:[#allocation5 + $0x384] ss:$16 sps:$4 sm:$0xff]   ;;  %v3129_v48 = vld [vmem:[#allocation5 + $0x380] ss:$16 sps:$4 sm:$0xff]  }
  0x58   :  { %1719 = vmatprep.subr.bf16.mxu1 %v3096_v25  ;;  %v3130_v51 = vld [vmem:[#allocation5 + $0x164] ss:$16 sps:$4 sm:$0xff]   ;;  %v3134_v54 = vld [vmem:[#allocation5 + $0x160] ss:$16 sps:$4 sm:$0xff]  }
  0x59   :  { %v3132_v53 = vld [vmem:[#allocation5 + $0x364] ss:$16 sps:$4 sm:$0xff]   ;;  %v3135_v55 = vld [vmem:[#allocation5 + $0x360] ss:$16 sps:$4 sm:$0xff]  }
  0x5a   :  { %1679 = vmatpush1.bf16.msra.mxu0 %v3098_v26  ;;  %v3136_v56 = vld [vmem:[#allocation5 + $0x144] ss:$16 sps:$4 sm:$0xff]   ;;  %v3140_v58 = vld [vmem:[#allocation5 + $0x140] ss:$16 sps:$4 sm:$0xff]  }
  0x5b   :  { %1720 = vmatpush1.bf16.msra.mxu1 %v3099_v27  ;;  %1680 = vmatprep.subr.bf16.mxu0 %v3100_v28  ;;  %v3138_v57 = vld [vmem:[#allocation5 + $0x344] ss:$16 sps:$4 sm:$0xff]   ;;  %v3141_v59 = vld [vmem:[#allocation5 + $0x340] ss:$16 sps:$4 sm:$0xff]  }
  0x5c   :  { %1721 = vmatprep.subr.bf16.mxu1 %v3102_v29  ;;  %v3142_v60 = vld [vmem:[#allocation5 + $0x124] ss:$16 sps:$4 sm:$0xff]   ;;  %v3146_v62 = vld [vmem:[#allocation5 + $0x120] ss:$16 sps:$4 sm:$0xff]  }
  0x5d   :  { %v3144_v61 = vld [vmem:[#allocation5 + $0x324] ss:$16 sps:$4 sm:$0xff]   ;;  %v3147_v63 = vld [vmem:[#allocation5 + $0x320] ss:$16 sps:$4 sm:$0xff]  }
  0x5e   :  { %1681 = vmatpush1.bf16.msra.mxu0 %v3104_v30  ;;  %v3148_v0 = vld [vmem:[#allocation5 + $0x104] ss:$16 sps:$4 sm:$0xff]   ;;  %v3152_v2 = vld [vmem:[#allocation5 + $0x100] ss:$16 sps:$4 sm:$0xff]  }
  0x5f   :  { %1722 = vmatpush1.bf16.msra.mxu1 %v3105_v31  ;;  %1682 = vmatprep.subr.bf16.mxu0 %v3106_v32  ;;  %v3150_v1 = vld [vmem:[#allocation5 + $0x304] ss:$16 sps:$4 sm:$0xff]   ;;  %v3153_v3 = vld [vmem:[#allocation5 + $0x300] ss:$16 sps:$4 sm:$0xff]  }
  0x60   :  { %1723 = vmatprep.subr.bf16.mxu1 %v3108_v33  ;;  %v92_v4 = vld [vmem:[#allocation2] sm:$0xff]  ;;  %v94_v5 = vld [vmem:[#allocation2 + $0x10] sm:$0xff] }
  0x61   :  { %v3156_v6 = vld [vmem:[#allocation5 + $0x4e4] ss:$16 sps:$4 sm:$0xff]   ;;  %v3759_v8 = vpack.c.bf16 %v92_v4, %v92_v4  ;;  %v3761_v9 = vpack.c.bf16 %v94_v5, %v94_v5  ;;  %v3154_v10 = vld [vmem:[#allocation5 + $0x4e0] ss:$16 sps:$4 sm:$0xff]  }
  0x62   :  { %1683 = vmatpush2.bf16.msra.mxu0 %v3110_v34  ;;  %v3159_v7 = vld [vmem:[#allocation5 + $0x6e4] ss:$16 sps:$4 sm:$0xff]   ;;  %v3157_v11 = vld [vmem:[#allocation5 + $0x6e0] ss:$16 sps:$4 sm:$0xff]   ;;  %v97_v34 = vld [vmem:[#allocation2 + $0x28] sm:$0xff] }
  0x63   :  { %1724 = vmatpush2.bf16.msra.mxu1 %v3111_v35  ;;  %1684 = vmatprep.subr.bf16.mxu0 %v3112_v36  ;;  %v3162_v12 = vld [vmem:[#allocation5 + $0x4c4] ss:$16 sps:$4 sm:$0xff]   ;;  %v3160_v14 = vld [vmem:[#allocation5 + $0x4c0] ss:$16 sps:$4 sm:$0xff]  }
  0x64   :  { %1725 = vmatprep.subr.bf16.mxu1 %v3114_v37  ;;  %v3165_v13 = vld [vmem:[#allocation5 + $0x6c4] ss:$16 sps:$4 sm:$0xff]   ;;  %v3163_v15 = vld [vmem:[#allocation5 + $0x6c0] ss:$16 sps:$4 sm:$0xff]   ;;  %v3765_v37 = vpack.c.bf16 %v97_v34, %v97_v34  ;;  %v3268_v34 = vld [vmem:[#allocation5 + $0x88] ss:$16 sps:$4 sm:$0xff]  }
  0x65   :  { %v3168_v16 = vld [vmem:[#allocation5 + $0x4a4] ss:$16 sps:$4 sm:$0xff]   ;;  %v3166_v18 = vld [vmem:[#allocation5 + $0x4a0] ss:$16 sps:$4 sm:$0xff]  }
  0x66   :  { %1685 = vmatpush2.bf16.msra.mxu0 %v3116_v38  ;;  %v3171_v17 = vld [vmem:[#allocation5 + $0x6a4] ss:$16 sps:$4 sm:$0xff]   ;;  %v3169_v19 = vld [vmem:[#allocation5 + $0x6a0] ss:$16 sps:$4 sm:$0xff]   ;;  %v99_v38 = vld [vmem:[#allocation2 + $0x38] sm:$0xff] }
  0x67   :  { %1726 = vmatpush2.bf16.msra.mxu1 %v3117_v39  ;;  %1686 = vmatprep.subr.bf16.mxu0 %v3118_v40  ;;  %v3174_v20 = vld [vmem:[#allocation5 + $0x484] ss:$16 sps:$4 sm:$0xff]   ;;  %v3172_v22 = vld [vmem:[#allocation5 + $0x480] ss:$16 sps:$4 sm:$0xff]   ;;  %v3767_v40 = vpack.c.bf16 %v99_v38, %v99_v38  ;;  %v3279_v38 = vld [vmem:[#allocation5 + $0x26c] ss:$16 sps:$4 sm:$0xff]  }
  0x68   :  { %1727 = vmatprep.subr.bf16.mxu1 %v3120_v41  ;;  %v3177_v21 = vld [vmem:[#allocation5 + $0x684] ss:$16 sps:$4 sm:$0xff]   ;;  %v3175_v23 = vld [vmem:[#allocation5 + $0x680] ss:$16 sps:$4 sm:$0xff]  }
  0x69   :  { %v3180_v24 = vld [vmem:[#allocation5 + $0x464] ss:$16 sps:$4 sm:$0xff]   ;;  %v3178_v26 = vld [vmem:[#allocation5 + $0x460] ss:$16 sps:$4 sm:$0xff]  }
  0x6a   :  { %1687 = vmatpush2.bf16.msra.mxu0 %v3122_v42  ;;  %v3183_v25 = vld [vmem:[#allocation5 + $0x664] ss:$16 sps:$4 sm:$0xff]   ;;  %v3181_v27 = vld [vmem:[#allocation5 + $0x660] ss:$16 sps:$4 sm:$0xff]  }
  0x6b   :  { %1728 = vmatpush2.bf16.msra.mxu1 %v3123_v43  ;;  %1688 = vmatprep.subr.bf16.mxu0 %v3124_v44  ;;  %v3186_v28 = vld [vmem:[#allocation5 + $0x444] ss:$16 sps:$4 sm:$0xff]   ;;  %v3184_v30 = vld [vmem:[#allocation5 + $0x440] ss:$16 sps:$4 sm:$0xff]  }
  0x6c   :  { %1729 = vmatprep.subr.bf16.mxu1 %v3126_v45  ;;  %v3189_v29 = vld [vmem:[#allocation5 + $0x644] ss:$16 sps:$4 sm:$0xff]   ;;  %v3187_v31 = vld [vmem:[#allocation5 + $0x640] ss:$16 sps:$4 sm:$0xff]  }
  0x6d   :  { %v3192_v32 = vld [vmem:[#allocation5 + $0x424] ss:$16 sps:$4 sm:$0xff]   ;;  %v3190_v35 = vld [vmem:[#allocation5 + $0x420] ss:$16 sps:$4 sm:$0xff]  }
  0x6e   :  { %1689 = vmatpush2.bf16.msra.mxu0 %v3128_v47  ;;  %v3195_v33 = vld [vmem:[#allocation5 + $0x624] ss:$16 sps:$4 sm:$0xff]   ;;  %v3193_v36 = vld [vmem:[#allocation5 + $0x620] ss:$16 sps:$4 sm:$0xff]  }
  0x6f   :  { %1730 = vmatpush2.bf16.msra.mxu1 %v3129_v48  ;;  %1690 = vmatprep.subr.bf16.mxu0 %v3130_v51  ;;  %v3198_v39 = vld [vmem:[#allocation5 + $0x404] ss:$16 sps:$4 sm:$0xff]   ;;  %v3196_v42 = vld [vmem:[#allocation5 + $0x400] ss:$16 sps:$4 sm:$0xff]  }
  0x70   :  { %1731 = vmatprep.subr.bf16.mxu1 %v3132_v53  ;;  %v3201_v41 = vld [vmem:[#allocation5 + $0x604] ss:$16 sps:$4 sm:$0xff]   ;;  %v3199_v43 = vld [vmem:[#allocation5 + $0x600] ss:$16 sps:$4 sm:$0xff]  }
  0x71   :  { %v3204_v44 = vld [vmem:[#allocation5 + $0x5e4] ss:$16 sps:$4 sm:$0xff]   ;;  %v3202_v46 = vld [vmem:[#allocation5 + $0x5e0] ss:$16 sps:$4 sm:$0xff]  }
  0x72   :  { %1691 = vmatpush2.bf16.msra.mxu0 %v3134_v54  ;;  %v3207_v45 = vld [vmem:[#allocation5 + $0x7e4] ss:$16 sps:$4 sm:$0xff]   ;;  %v3205_v47 = vld [vmem:[#allocation5 + $0x7e0] ss:$16 sps:$4 sm:$0xff]  }
  0x73   :  { %1732 = vmatpush2.bf16.msra.mxu1 %v3135_v55  ;;  %1692 = vmatprep.subr.bf16.mxu0 %v3136_v56  ;;  %v3210_v48 = vld [vmem:[#allocation5 + $0x5c4] ss:$16 sps:$4 sm:$0xff]   ;;  %v3208_v51 = vld [vmem:[#allocation5 + $0x5c0] ss:$16 sps:$4 sm:$0xff]  }
  0x74   :  { %1733 = vmatprep.subr.bf16.mxu1 %v3138_v57  ;;  %v3213_v50 = vld [vmem:[#allocation5 + $0x7c4] ss:$16 sps:$4 sm:$0xff]   ;;  %v3211_v53 = vld [vmem:[#allocation5 + $0x7c0] ss:$16 sps:$4 sm:$0xff]  }
  0x75   :  { %v3216_v54 = vld [vmem:[#allocation5 + $0x5a4] ss:$16 sps:$4 sm:$0xff]   ;;  %v3214_v56 = vld [vmem:[#allocation5 + $0x5a0] ss:$16 sps:$4 sm:$0xff]  }
  0x76   :  { %1693 = vmatpush2.bf16.msra.mxu0 %v3140_v58  ;;  %v3219_v55 = vld [vmem:[#allocation5 + $0x7a4] ss:$16 sps:$4 sm:$0xff]   ;;  %v3217_v57 = vld [vmem:[#allocation5 + $0x7a0] ss:$16 sps:$4 sm:$0xff]  }
  0x77   :  { %1734 = vmatpush2.bf16.msra.mxu1 %v3141_v59  ;;  %1694 = vmatprep.subr.bf16.mxu0 %v3142_v60  ;;  %v3222_v58 = vld [vmem:[#allocation5 + $0x584] ss:$16 sps:$4 sm:$0xff]   ;;  %v3220_v60 = vld [vmem:[#allocation5 + $0x580] ss:$16 sps:$4 sm:$0xff]  }
  0x78   :  { %1735 = vmatprep.subr.bf16.mxu1 %v3144_v61  ;;  %v3225_v59 = vld [vmem:[#allocation5 + $0x784] ss:$16 sps:$4 sm:$0xff]   ;;  %v3223_v61 = vld [vmem:[#allocation5 + $0x780] ss:$16 sps:$4 sm:$0xff]  }
  0x79   :  { %v3232_v4 = vld [vmem:[#allocation5 + $0x540] ss:$16 sps:$4 sm:$0xff]  }
  0x7a   :  { %1695 = vmatpush2.bf16.msra.mxu0 %v3146_v62  ;;  %v3228_v62 = vld [vmem:[#allocation5 + $0x564] ss:$16 sps:$4 sm:$0xff]   ;;  %v3235_v5 = vld [vmem:[#allocation5 + $0x740] ss:$16 sps:$4 sm:$0xff]  }
  0x7b   :  { %1736 = vmatpush2.bf16.msra.mxu1 %v3147_v63  ;;  %1696 = vmatprep.subr.bf16.mxu0 %v3148_v0  ;;  %v3231_v63 = vld [vmem:[#allocation5 + $0x764] ss:$16 sps:$4 sm:$0xff]   ;;  %v3226_v0 = vld [vmem:[#allocation5 + $0x560] ss:$16 sps:$4 sm:$0xff]  }
  0x7c   :  { %1737 = vmatprep.subr.bf16.mxu1 %v3150_v1  ;;  %v3229_v1 = vld [vmem:[#allocation5 + $0x760] ss:$16 sps:$4 sm:$0xff]  }
  0x7e   :  { %1697 = vmatpush2.bf16.msra.mxu0 %v3152_v2  ;;  %v3234_v2 = vld [vmem:[#allocation5 + $0x544] ss:$16 sps:$4 sm:$0xff]  }
  0x7f   :  { %1738 = vmatpush2.bf16.msra.mxu1 %v3153_v3  ;;  %1748 = vmatprep.subr.bf16.mxu0 %v3156_v6  ;;  %v3237_v3 = vld [vmem:[#allocation5 + $0x744] ss:$16 sps:$4 sm:$0xff]  }
  0x80   :  { %1789 = vmatprep.subr.bf16.mxu1 %v3159_v7  ;;  %v3240_v6 = vld [vmem:[#allocation5 + $0x524] ss:$16 sps:$4 sm:$0xff]  }
  0x81   :  { %1699 = vmatmul.mubr.bf16.vlgmr.msra.gmra.mxu0 %v3759_v8  ;;  %v3243_v7 = vld [vmem:[#allocation5 + $0x724] ss:$16 sps:$4 sm:$0xff]  }
  0x82   :  { %1740 = vmatmul.mubr.bf16.vlgmr.msra.gmra.mxu1 %v3761_v9  ;;  %1749 = vmatpush1.bf16.msra.mxu0 %v3154_v10  ;;  %v3238_v10 = vld [vmem:[#allocation5 + $0x520] ss:$16 sps:$4 sm:$0xff]  }
  0x83   :  { %1790 = vmatpush1.bf16.msra.mxu1 %v3157_v11  ;;  %1750 = vmatprep.subr.bf16.mxu0 %v3162_v12  ;;  %v3241_v11 = vld [vmem:[#allocation5 + $0x720] ss:$16 sps:$4 sm:$0xff]   ;;  %v3246_v12 = vld [vmem:[#allocation5 + $0x504] ss:$16 sps:$4 sm:$0xff]  }
  0x84   :  { %1791 = vmatprep.subr.bf16.mxu1 %v3165_v13  ;;  %1780 = vmatprep.mubr.bf16.mxu0 %v3765_v37  ;;  %v3249_v13 = vld [vmem:[#allocation5 + $0x704] ss:$16 sps:$4 sm:$0xff]  }
  0x85   :  { %1821 = vmatprep.mubr.bf16.mxu1 %v3767_v40 }
  0x86   :  { %1751 = vmatpush1.bf16.msra.mxu0 %v3160_v14  ;;  %v3244_v14 = vld [vmem:[#allocation5 + $0x500] ss:$16 sps:$4 sm:$0xff]  }
  0x87   :  { %1792 = vmatpush1.bf16.msra.mxu1 %v3163_v15  ;;  %1752 = vmatprep.subr.bf16.mxu0 %v3168_v16  ;;  %v3247_v15 = vld [vmem:[#allocation5 + $0x700] ss:$16 sps:$4 sm:$0xff]  }
  0x88   :  { %1793 = vmatprep.subr.bf16.mxu1 %v3171_v17  ;;  %v96_v16 = vld [vmem:[#allocation2 + $0x20] sm:$0xff]  ;;  %v98_v17 = vld [vmem:[#allocation2 + $0x30] sm:$0xff] }
  0x8a   :  { %1753 = vmatpush1.bf16.msra.mxu0 %v3166_v18  ;;  %v3252_v18 = vld [vmem:[#allocation5 + $0xec] ss:$16 sps:$4 sm:$0xff]  }
  0x8b   :  { %1794 = vmatpush1.bf16.msra.mxu1 %v3169_v19  ;;  %1754 = vmatprep.subr.bf16.mxu0 %v3174_v20  ;;  %v3255_v19 = vld [vmem:[#allocation5 + $0x2ec] ss:$16 sps:$4 sm:$0xff]   ;;  %v3771_v20 = vpack.c.bf16 %v96_v16, %v96_v16 }
  0x8c   :  { %1795 = vmatprep.subr.bf16.mxu1 %v3177_v21  ;;  %v3773_v21 = vpack.c.bf16 %v98_v17, %v98_v17  ;;  %v3336_v16 = vld [vmem:[#allocation5 + $0x12c] ss:$16 sps:$4 sm:$0xff]  }
  0x8d   :  { %v3339_v17 = vld [vmem:[#allocation5 + $0x32c] ss:$16 sps:$4 sm:$0xff]  }
  0x8e   :  { %1755 = vmatpush1.bf16.msra.mxu0 %v3172_v22  ;;  %v3250_v22 = vld [vmem:[#allocation5 + $0xe8] ss:$16 sps:$4 sm:$0xff]  }
  0x8f   :  { %1796 = vmatpush1.bf16.msra.mxu1 %v3175_v23  ;;  %1756 = vmatprep.subr.bf16.mxu0 %v3180_v24  ;;  %v3253_v23 = vld [vmem:[#allocation5 + $0x2e8] ss:$16 sps:$4 sm:$0xff]   ;;  %v3258_v24 = vld [vmem:[#allocation5 + $0xcc] ss:$16 sps:$4 sm:$0xff]  }
  0x90   :  { %1797 = vmatprep.subr.bf16.mxu1 %v3183_v25  ;;  %v3261_v25 = vld [vmem:[#allocation5 + $0x2cc] ss:$16 sps:$4 sm:$0xff]  }
  0x92   :  { %1757 = vmatpush1.bf16.msra.mxu0 %v3178_v26  ;;  %v3256_v26 = vld [vmem:[#allocation5 + $0xc8] ss:$16 sps:$4 sm:$0xff]  }
  0x93   :  { %1798 = vmatpush1.bf16.msra.mxu1 %v3181_v27  ;;  %1758 = vmatprep.subr.bf16.mxu0 %v3186_v28  ;;  %v3259_v27 = vld [vmem:[#allocation5 + $0x2c8] ss:$16 sps:$4 sm:$0xff]   ;;  %v3264_v28 = vld [vmem:[#allocation5 + $0xac] ss:$16 sps:$4 sm:$0xff]  }
  0x94   :  { %1799 = vmatprep.subr.bf16.mxu1 %v3189_v29  ;;  %v3267_v29 = vld [vmem:[#allocation5 + $0x2ac] ss:$16 sps:$4 sm:$0xff]  }
  0x96   :  { %1759 = vmatpush1.bf16.msra.mxu0 %v3184_v30  ;;  %v3262_v30 = vld [vmem:[#allocation5 + $0xa8] ss:$16 sps:$4 sm:$0xff]  }
  0x97   :  { %1800 = vmatpush1.bf16.msra.mxu1 %v3187_v31  ;;  %1760 = vmatprep.subr.bf16.mxu0 %v3192_v32  ;;  %v3265_v31 = vld [vmem:[#allocation5 + $0x2a8] ss:$16 sps:$4 sm:$0xff]   ;;  %v3270_v32 = vld [vmem:[#allocation5 + $0x8c] ss:$16 sps:$4 sm:$0xff]  }
  0x98   :  { %1801 = vmatprep.subr.bf16.mxu1 %v3195_v33  ;;  %v3273_v33 = vld [vmem:[#allocation5 + $0x28c] ss:$16 sps:$4 sm:$0xff]  }
  0x9a   :  { %1761 = vmatpush1.bf16.msra.mxu0 %v3190_v35  ;;  %v3271_v35 = vld [vmem:[#allocation5 + $0x288] ss:$16 sps:$4 sm:$0xff]  }
  0x9b   :  { %1802 = vmatpush1.bf16.msra.mxu1 %v3193_v36  ;;  %1762 = vmatprep.subr.bf16.mxu0 %v3198_v39  ;;  %v3276_v36 = vld [vmem:[#allocation5 + $0x6c] ss:$16 sps:$4 sm:$0xff]   ;;  %v3274_v39 = vld [vmem:[#allocation5 + $0x68] ss:$16 sps:$4 sm:$0xff]  }
  0x9c   :  { %1803 = vmatprep.subr.bf16.mxu1 %v3201_v41  ;;  %v3285_v41 = vld [vmem:[#allocation5 + $0x24c] ss:$16 sps:$4 sm:$0xff]  }
  0x9e   :  { %1763 = vmatpush1.bf16.msra.mxu0 %v3196_v42  ;;  %v3280_v42 = vld [vmem:[#allocation5 + $0x48] ss:$16 sps:$4 sm:$0xff]  }
  0x9f   :  { %1804 = vmatpush1.bf16.msra.mxu1 %v3199_v43  ;;  %1764 = vmatprep.subr.bf16.mxu0 %v3204_v44  ;;  %v3283_v43 = vld [vmem:[#allocation5 + $0x248] ss:$16 sps:$4 sm:$0xff]   ;;  %v3288_v44 = vld [vmem:[#allocation5 + $0x2c] ss:$16 sps:$4 sm:$0xff]  }
  0xa0   :  { %1805 = vmatprep.subr.bf16.mxu1 %v3207_v45  ;;  %v3291_v45 = vld [vmem:[#allocation5 + $0x22c] ss:$16 sps:$4 sm:$0xff]  }
  0xa2   :  { %1765 = vmatpush2.bf16.msra.mxu0 %v3202_v46  ;;  %v3286_v46 = vld [vmem:[#allocation5 + $0x28] ss:$16 sps:$4 sm:$0xff]  }
  0xa3   :  { %1806 = vmatpush2.bf16.msra.mxu1 %v3205_v47  ;;  %1766 = vmatprep.subr.bf16.mxu0 %v3210_v48  ;;  %v3289_v47 = vld [vmem:[#allocation5 + $0x228] ss:$16 sps:$4 sm:$0xff]   ;;  %v3294_v48 = vld [vmem:[#allocation5 + $0xc] ss:$16 sps:$4 sm:$0xff]  }
  0xa4   :  { %1807 = vmatprep.subr.bf16.mxu1 %v3213_v50  ;;  %v3297_v50 = vld [vmem:[#allocation5 + $0x20c] ss:$16 sps:$4 sm:$0xff]  }
  0xa6   :  { %1767 = vmatpush2.bf16.msra.mxu0 %v3208_v51  ;;  %v3292_v51 = vld [vmem:[#allocation5 + $0x8] ss:$16 sps:$4 sm:$0xff]  }
  0xa7   :  { %1808 = vmatpush2.bf16.msra.mxu1 %v3211_v53  ;;  %1768 = vmatprep.subr.bf16.mxu0 %v3216_v54  ;;  %v3295_v53 = vld [vmem:[#allocation5 + $0x208] ss:$16 sps:$4 sm:$0xff]   ;;  %v3300_v54 = vld [vmem:[#allocation5 + $0x1ec] ss:$16 sps:$4 sm:$0xff]  }
  0xa8   :  { %1809 = vmatprep.subr.bf16.mxu1 %v3219_v55  ;;  %v3303_v55 = vld [vmem:[#allocation5 + $0x3ec] ss:$16 sps:$4 sm:$0xff]  }
  0xaa   :  { %1769 = vmatpush2.bf16.msra.mxu0 %v3214_v56  ;;  %v3298_v56 = vld [vmem:[#allocation5 + $0x1e8] ss:$16 sps:$4 sm:$0xff]  }
  0xab   :  { %1810 = vmatpush2.bf16.msra.mxu1 %v3217_v57  ;;  %1770 = vmatprep.subr.bf16.mxu0 %v3222_v58  ;;  %v3301_v57 = vld [vmem:[#allocation5 + $0x3e8] ss:$16 sps:$4 sm:$0xff]   ;;  %v3306_v58 = vld [vmem:[#allocation5 + $0x1cc] ss:$16 sps:$4 sm:$0xff]  }
  0xac   :  { %1811 = vmatprep.subr.bf16.mxu1 %v3225_v59  ;;  %v3309_v59 = vld [vmem:[#allocation5 + $0x3cc] ss:$16 sps:$4 sm:$0xff]  }
  0xae   :  { %1771 = vmatpush2.bf16.msra.mxu0 %v3220_v60  ;;  %v3304_v60 = vld [vmem:[#allocation5 + $0x1c8] ss:$16 sps:$4 sm:$0xff]  }
  0xaf   :  { %1812 = vmatpush2.bf16.msra.mxu1 %v3223_v61  ;;  %1772 = vmatprep.subr.bf16.mxu0 %v3228_v62  ;;  %v3307_v61 = vld [vmem:[#allocation5 + $0x3c8] ss:$16 sps:$4 sm:$0xff]   ;;  %v3312_v62 = vld [vmem:[#allocation5 + $0x1ac] ss:$16 sps:$4 sm:$0xff]  }
  0xb0   :  { %1813 = vmatprep.subr.bf16.mxu1 %v3231_v63  ;;  %v3315_v63 = vld [vmem:[#allocation5 + $0x3ac] ss:$16 sps:$4 sm:$0xff]  }
  0xb2   :  { %1773 = vmatpush2.bf16.msra.mxu0 %v3226_v0  ;;  %v3310_v0 = vld [vmem:[#allocation5 + $0x1a8] ss:$16 sps:$4 sm:$0xff]  }
  0xb3   :  { %1814 = vmatpush2.bf16.msra.mxu1 %v3229_v1  ;;  %1774 = vmatprep.subr.bf16.mxu0 %v3234_v2  ;;  %v3313_v1 = vld [vmem:[#allocation5 + $0x3a8] ss:$16 sps:$4 sm:$0xff]   ;;  %v3318_v2 = vld [vmem:[#allocation5 + $0x18c] ss:$16 sps:$4 sm:$0xff]  }
  0xb4   :  { %1815 = vmatprep.subr.bf16.mxu1 %v3237_v3  ;;  %v3321_v3 = vld [vmem:[#allocation5 + $0x38c] ss:$16 sps:$4 sm:$0xff]  }
  0xb6   :  { %1775 = vmatpush2.bf16.msra.mxu0 %v3232_v4  ;;  %v3316_v4 = vld [vmem:[#allocation5 + $0x188] ss:$16 sps:$4 sm:$0xff]  }
  0xb7   :  { %1816 = vmatpush2.bf16.msra.mxu1 %v3235_v5  ;;  %1776 = vmatprep.subr.bf16.mxu0 %v3240_v6  ;;  %v3319_v5 = vld [vmem:[#allocation5 + $0x388] ss:$16 sps:$4 sm:$0xff]   ;;  %v3324_v6 = vld [vmem:[#allocation5 + $0x16c] ss:$16 sps:$4 sm:$0xff]  }
  0xb8   :  { %1817 = vmatprep.subr.bf16.mxu1 %v3243_v7  ;;  %v3327_v7 = vld [vmem:[#allocation5 + $0x36c] ss:$16 sps:$4 sm:$0xff]  }
  0xba   :  { %1777 = vmatpush2.bf16.msra.mxu0 %v3238_v10  ;;  %v3322_v10 = vld [vmem:[#allocation5 + $0x168] ss:$16 sps:$4 sm:$0xff]  }
  0xbb   :  { %1818 = vmatpush2.bf16.msra.mxu1 %v3241_v11  ;;  %1778 = vmatprep.subr.bf16.mxu0 %v3246_v12  ;;  %v3325_v11 = vld [vmem:[#allocation5 + $0x368] ss:$16 sps:$4 sm:$0xff]   ;;  %v3330_v12 = vld [vmem:[#allocation5 + $0x14c] ss:$16 sps:$4 sm:$0xff]  }
  0xbc   :  { %1819 = vmatprep.subr.bf16.mxu1 %v3249_v13  ;;  %v3333_v13 = vld [vmem:[#allocation5 + $0x34c] ss:$16 sps:$4 sm:$0xff]  }
  0xbe   :  { %1779 = vmatpush2.bf16.msra.mxu0 %v3244_v14  ;;  %v3328_v14 = vld [vmem:[#allocation5 + $0x148] ss:$16 sps:$4 sm:$0xff]  }
  0xbf   :  { %1820 = vmatpush2.bf16.msra.mxu1 %v3247_v15  ;;  %1830 = vmatprep.subr.bf16.mxu0 %v3252_v18  ;;  %v3331_v15 = vld [vmem:[#allocation5 + $0x348] ss:$16 sps:$4 sm:$0xff]  }
  0xc0   :  { %1871 = vmatprep.subr.bf16.mxu1 %v3255_v19  ;;  %v3334_v18 = vld [vmem:[#allocation5 + $0x128] ss:$16 sps:$4 sm:$0xff]  }
  0xc1   :  { %1781 = vmatmul.mubr.bf16.vlgmr.msra.gmra.mxu0 %v3771_v20  ;;  %v3337_v19 = vld [vmem:[#allocation5 + $0x328] ss:$16 sps:$4 sm:$0xff]  }
  0xc2   :  { %1822 = vmatmul.mubr.bf16.vlgmr.msra.gmra.mxu1 %v3773_v21  ;;  %1831 = vmatpush1.bf16.msra.mxu0 %v3250_v22  ;;  %v3342_v22 = vld [vmem:[#allocation5 + $0x10c] ss:$16 sps:$4 sm:$0xff]  }
  0xc3   :  { %1872 = vmatpush1.bf16.msra.mxu1 %v3253_v23  ;;  %1832 = vmatprep.subr.bf16.mxu0 %v3258_v24  ;;  %v3345_v23 = vld [vmem:[#allocation5 + $0x30c] ss:$16 sps:$4 sm:$0xff]   ;;  %v3340_v24 = vld [vmem:[#allocation5 + $0x108] ss:$16 sps:$4 sm:$0xff]  }
  0xc4   :  { %1873 = vmatprep.subr.bf16.mxu1 %v3261_v25  ;;  %1862 = vmatprep.mubr.bf16.mxu0 %v3753_v49  ;;  %v3277_v49 = vld [vmem:[#allocation5 + $0x268] ss:$16 sps:$4 sm:$0xff]  }
  0xc5   :  { %1903 = vmatprep.mubr.bf16.mxu1 %v3755_v52  ;;  %v3282_v52 = vld [vmem:[#allocation5 + $0x4c] ss:$16 sps:$4 sm:$0xff]   ;;  %v3343_v25 = vld [vmem:[#allocation5 + $0x308] ss:$16 sps:$4 sm:$0xff]  }
  0xc6   :  { %1833 = vmatpush1.bf16.msra.mxu0 %v3256_v26  ;;  %v3348_v26 = vld [vmem:[#allocation5 + $0x4ec] ss:$16 sps:$4 sm:$0xff]  }
  0xc7   :  { %1874 = vmatpush1.bf16.msra.mxu1 %v3259_v27  ;;  %1834 = vmatprep.subr.bf16.mxu0 %v3264_v28  ;;  %v3351_v27 = vld [vmem:[#allocation5 + $0x6ec] ss:$16 sps:$4 sm:$0xff]   ;;  %v3346_v28 = vld [vmem:[#allocation5 + $0x4e8] ss:$16 sps:$4 sm:$0xff]  }
  0xc8   :  { %1875 = vmatprep.subr.bf16.mxu1 %v3267_v29  ;;  %v3349_v29 = vld [vmem:[#allocation5 + $0x6e8] ss:$16 sps:$4 sm:$0xff]  }
  0xca   :  { %1835 = vmatpush1.bf16.msra.mxu0 %v3262_v30  ;;  %v3354_v30 = vld [vmem:[#allocation5 + $0x4cc] ss:$16 sps:$4 sm:$0xff]  }
  0xcb   :  { %1876 = vmatpush1.bf16.msra.mxu1 %v3265_v31  ;;  %1836 = vmatprep.subr.bf16.mxu0 %v3270_v32  ;;  %v3357_v31 = vld [vmem:[#allocation5 + $0x6cc] ss:$16 sps:$4 sm:$0xff]   ;;  %v3352_v32 = vld [vmem:[#allocation5 + $0x4c8] ss:$16 sps:$4 sm:$0xff]  }
  0xcc   :  { %1877 = vmatprep.subr.bf16.mxu1 %v3273_v33  ;;  %v3355_v33 = vld [vmem:[#allocation5 + $0x6c8] ss:$16 sps:$4 sm:$0xff]  }
  0xce   :  { %1837 = vmatpush1.bf16.msra.mxu0 %v3268_v34  ;;  %v3360_v34 = vld [vmem:[#allocation5 + $0x4ac] ss:$16 sps:$4 sm:$0xff]  }
  0xcf   :  { %1878 = vmatpush1.bf16.msra.mxu1 %v3271_v35  ;;  %1838 = vmatprep.subr.bf16.mxu0 %v3276_v36  ;;  %v3363_v35 = vld [vmem:[#allocation5 + $0x6ac] ss:$16 sps:$4 sm:$0xff]   ;;  %v3358_v36 = vld [vmem:[#allocation5 + $0x4a8] ss:$16 sps:$4 sm:$0xff]  }
  0xd0   :  { %1879 = vmatprep.subr.bf16.mxu1 %v3279_v38  ;;  %v3361_v38 = vld [vmem:[#allocation5 + $0x6a8] ss:$16 sps:$4 sm:$0xff]  }
  0xd2   :  { %1839 = vmatpush1.bf16.msra.mxu0 %v3274_v39  ;;  %v3366_v39 = vld [vmem:[#allocation5 + $0x48c] ss:$16 sps:$4 sm:$0xff]  }
  0xd3   :  { %1880 = vmatpush1.bf16.msra.mxu1 %v3277_v49  ;;  %1840 = vmatprep.subr.bf16.mxu0 %v3282_v52  ;;  %v3364_v49 = vld [vmem:[#allocation5 + $0x488] ss:$16 sps:$4 sm:$0xff]   ;;  %v3372_v52 = vld [vmem:[#allocation5 + $0x46c] ss:$16 sps:$4 sm:$0xff]  }
  0xd4   :  { %1881 = vmatprep.subr.bf16.mxu1 %v3285_v41  ;;  %v3375_v41 = vld [vmem:[#allocation5 + $0x66c] ss:$16 sps:$4 sm:$0xff]  }
  0xd6   :  { %1841 = vmatpush1.bf16.msra.mxu0 %v3280_v42  ;;  %v3370_v42 = vld [vmem:[#allocation5 + $0x468] ss:$16 sps:$4 sm:$0xff]  }
  0xd7   :  { %1882 = vmatpush1.bf16.msra.mxu1 %v3283_v43  ;;  %1842 = vmatprep.subr.bf16.mxu0 %v3288_v44  ;;  %v3373_v43 = vld [vmem:[#allocation5 + $0x668] ss:$16 sps:$4 sm:$0xff]   ;;  %v3378_v44 = vld [vmem:[#allocation5 + $0x44c] ss:$16 sps:$4 sm:$0xff]  }
  0xd8   :  { %1883 = vmatprep.subr.bf16.mxu1 %v3291_v45  ;;  %v3379_v45 = vld [vmem:[#allocation5 + $0x648] ss:$16 sps:$4 sm:$0xff]  }
  0xda   :  { %1843 = vmatpush1.bf16.msra.mxu0 %v3286_v46  ;;  %v3384_v46 = vld [vmem:[#allocation5 + $0x42c] ss:$16 sps:$4 sm:$0xff]  }
  0xdb   :  { %1884 = vmatpush1.bf16.msra.mxu1 %v3289_v47  ;;  %1844 = vmatprep.subr.bf16.mxu0 %v3294_v48  ;;  %v3387_v47 = vld [vmem:[#allocation5 + $0x62c] ss:$16 sps:$4 sm:$0xff]   ;;  %v3382_v48 = vld [vmem:[#allocation5 + $0x428] ss:$16 sps:$4 sm:$0xff]  }
  0xdc   :  { %1885 = vmatprep.subr.bf16.mxu1 %v3297_v50  ;;  %v3385_v50 = vld [vmem:[#allocation5 + $0x628] ss:$16 sps:$4 sm:$0xff]  }
  0xde   :  { %1845 = vmatpush1.bf16.msra.mxu0 %v3292_v51  ;;  %v3390_v51 = vld [vmem:[#allocation5 + $0x40c] ss:$16 sps:$4 sm:$0xff]  }
  0xdf   :  { %1886 = vmatpush1.bf16.msra.mxu1 %v3295_v53  ;;  %1846 = vmatprep.subr.bf16.mxu0 %v3300_v54  ;;  %v3393_v53 = vld [vmem:[#allocation5 + $0x60c] ss:$16 sps:$4 sm:$0xff]   ;;  %v3388_v54 = vld [vmem:[#allocation5 + $0x408] ss:$16 sps:$4 sm:$0xff]  }
  0xe0   :  { %1887 = vmatprep.subr.bf16.mxu1 %v3303_v55  ;;  %v3391_v55 = vld [vmem:[#allocation5 + $0x608] ss:$16 sps:$4 sm:$0xff]  }
  0xe2   :  { %1847 = vmatpush2.bf16.msra.mxu0 %v3298_v56  ;;  %v3396_v56 = vld [vmem:[#allocation5 + $0x5ec] ss:$16 sps:$4 sm:$0xff]  }
  0xe3   :  { %1888 = vmatpush2.bf16.msra.mxu1 %v3301_v57  ;;  %1848 = vmatprep.subr.bf16.mxu0 %v3306_v58  ;;  %v3399_v57 = vld [vmem:[#allocation5 + $0x7ec] ss:$16 sps:$4 sm:$0xff]   ;;  %v3394_v58 = vld [vmem:[#allocation5 + $0x5e8] ss:$16 sps:$4 sm:$0xff]  }
  0xe4   :  { %1889 = vmatprep.subr.bf16.mxu1 %v3309_v59  ;;  %v3397_v59 = vld [vmem:[#allocation5 + $0x7e8] ss:$16 sps:$4 sm:$0xff]  }
  0xe6   :  { %1849 = vmatpush2.bf16.msra.mxu0 %v3304_v60  ;;  %v3402_v60 = vld [vmem:[#allocation5 + $0x5cc] ss:$16 sps:$4 sm:$0xff]  }
  0xe7   :  { %1890 = vmatpush2.bf16.msra.mxu1 %v3307_v61  ;;  %1850 = vmatprep.subr.bf16.mxu0 %v3312_v62  ;;  %v3405_v61 = vld [vmem:[#allocation5 + $0x7cc] ss:$16 sps:$4 sm:$0xff]   ;;  %v3400_v62 = vld [vmem:[#allocation5 + $0x5c8] ss:$16 sps:$4 sm:$0xff]  }
  0xe8   :  { %1891 = vmatprep.subr.bf16.mxu1 %v3315_v63  ;;  %v3403_v63 = vld [vmem:[#allocation5 + $0x7c8] ss:$16 sps:$4 sm:$0xff]  }
  0xea   :  { %1851 = vmatpush2.bf16.msra.mxu0 %v3310_v0  ;;  %v3408_v0 = vld [vmem:[#allocation5 + $0x5ac] ss:$16 sps:$4 sm:$0xff]  }
  0xeb   :  { %1892 = vmatpush2.bf16.msra.mxu1 %v3313_v1  ;;  %1852 = vmatprep.subr.bf16.mxu0 %v3318_v2  ;;  %v3411_v1 = vld [vmem:[#allocation5 + $0x7ac] ss:$16 sps:$4 sm:$0xff]   ;;  %v3406_v2 = vld [vmem:[#allocation5 + $0x5a8] ss:$16 sps:$4 sm:$0xff]  }
  0xec   :  { %1893 = vmatprep.subr.bf16.mxu1 %v3321_v3  ;;  %v3409_v3 = vld [vmem:[#allocation5 + $0x7a8] ss:$16 sps:$4 sm:$0xff]  }
  0xee   :  { %1853 = vmatpush2.bf16.msra.mxu0 %v3316_v4  ;;  %v3414_v4 = vld [vmem:[#allocation5 + $0x58c] ss:$16 sps:$4 sm:$0xff]  }
  0xef   :  { %1894 = vmatpush2.bf16.msra.mxu1 %v3319_v5  ;;  %1854 = vmatprep.subr.bf16.mxu0 %v3324_v6  ;;  %v3417_v5 = vld [vmem:[#allocation5 + $0x78c] ss:$16 sps:$4 sm:$0xff]   ;;  %v3412_v6 = vld [vmem:[#allocation5 + $0x588] ss:$16 sps:$4 sm:$0xff]  }
  0xf0   :  { %1895 = vmatprep.subr.bf16.mxu1 %v3327_v7  ;;  %v3415_v7 = vld [vmem:[#allocation5 + $0x788] ss:$16 sps:$4 sm:$0xff]  }
  0xf2   :  { %1855 = vmatpush2.bf16.msra.mxu0 %v3322_v10  ;;  %v3420_v10 = vld [vmem:[#allocation5 + $0x56c] ss:$16 sps:$4 sm:$0xff]  }
  0xf3   :  { %1896 = vmatpush2.bf16.msra.mxu1 %v3325_v11  ;;  %1856 = vmatprep.subr.bf16.mxu0 %v3330_v12  ;;  %v3423_v11 = vld [vmem:[#allocation5 + $0x76c] ss:$16 sps:$4 sm:$0xff]   ;;  %v3418_v12 = vld [vmem:[#allocation5 + $0x568] ss:$16 sps:$4 sm:$0xff]  }
  0xf4   :  { %1897 = vmatprep.subr.bf16.mxu1 %v3333_v13  ;;  %v3421_v13 = vld [vmem:[#allocation5 + $0x768] ss:$16 sps:$4 sm:$0xff]  }
  0xf6   :  { %1857 = vmatpush2.bf16.msra.mxu0 %v3328_v14  ;;  %v3426_v14 = vld [vmem:[#allocation5 + $0x54c] ss:$16 sps:$4 sm:$0xff]  }
  0xf7   :  { %1898 = vmatpush2.bf16.msra.mxu1 %v3331_v15  ;;  %1858 = vmatprep.subr.bf16.mxu0 %v3336_v16  ;;  %v3429_v15 = vld [vmem:[#allocation5 + $0x74c] ss:$16 sps:$4 sm:$0xff]   ;;  %v3424_v16 = vld [vmem:[#allocation5 + $0x548] ss:$16 sps:$4 sm:$0xff]  }
  0xf8   :  { %1899 = vmatprep.subr.bf16.mxu1 %v3339_v17  ;;  %v3427_v17 = vld [vmem:[#allocation5 + $0x748] ss:$16 sps:$4 sm:$0xff]  }
  0xfa   :  { %1859 = vmatpush2.bf16.msra.mxu0 %v3334_v18  ;;  %v3432_v18 = vld [vmem:[#allocation5 + $0x52c] ss:$16 sps:$4 sm:$0xff]  }
  0xfb   :  { %1900 = vmatpush2.bf16.msra.mxu1 %v3337_v19  ;;  %1860 = vmatprep.subr.bf16.mxu0 %v3342_v22  ;;  %v3435_v19 = vld [vmem:[#allocation5 + $0x72c] ss:$16 sps:$4 sm:$0xff]   ;;  %v3430_v22 = vld [vmem:[#allocation5 + $0x528] ss:$16 sps:$4 sm:$0xff]  }
  0xfc   :  { %1901 = vmatprep.subr.bf16.mxu1 %v3345_v23  ;;  %v3433_v23 = vld [vmem:[#allocation5 + $0x728] ss:$16 sps:$4 sm:$0xff]  }
  0xfe   :  { %1861 = vmatpush2.bf16.msra.mxu0 %v3340_v24  ;;  %v3438_v24 = vld [vmem:[#allocation5 + $0x50c] ss:$16 sps:$4 sm:$0xff]  }
  0xff   :  { %1902 = vmatpush2.bf16.msra.mxu1 %v3343_v25  ;;  %1912 = vmatprep.subr.bf16.mxu0 %v3348_v26  ;;  %v3441_v25 = vld [vmem:[#allocation5 + $0x70c] ss:$16 sps:$4 sm:$0xff]   ;;  %v3436_v26 = vld [vmem:[#allocation5 + $0x508] ss:$16 sps:$4 sm:$0xff]  }
 0x100   :  { %1953 = vmatprep.subr.bf16.mxu1 %v3351_v27  ;;  %v3439_v27 = vld [vmem:[#allocation5 + $0x708] ss:$16 sps:$4 sm:$0xff]  }
 0x101   :  { %1863 = vmatmul.mubr.bf16.vlgmr.msra.gmra.mxu0 %v3759_v8  ;;  %v3369_v8 = vld [vmem:[#allocation5 + $0x68c] ss:$16 sps:$4 sm:$0xff]  }
 0x102   :  { %1904 = vmatmul.mubr.bf16.vlgmr.msra.gmra.mxu1 %v3761_v9  ;;  %1913 = vmatpush1.bf16.msra.mxu0 %v3346_v28  ;;  %v3367_v9 = vld [vmem:[#allocation5 + $0x688] ss:$16 sps:$4 sm:$0xff]  }
 0x103   :  { %1954 = vmatpush1.bf16.msra.mxu1 %v3349_v29  ;;  %1914 = vmatprep.subr.bf16.mxu0 %v3354_v30  ;;  %v3444_v28 = vld [vmem:[#allocation8 + $0x74] ss:$8 sps:$4 sm:$0xff]   ;;  %v3442_v29 = vld [vmem:[#allocation8 + $0x70] ss:$8 sps:$4 sm:$0xff]   ;;  %v3447_v30 = vld [vmem:[#allocation8 + $0x64] ss:$8 sps:$4 sm:$0xff]  }
 0x104   :  { %1955 = vmatprep.subr.bf16.mxu1 %v3357_v31  ;;  %1944 = vmatprep.mubr.bf16.mxu0 %v3765_v37  ;;  %v3381_v37 = vld [vmem:[#allocation5 + $0x64c] ss:$16 sps:$4 sm:$0xff]  }
 0x105   :  { %1985 = vmatprep.mubr.bf16.mxu1 %v3767_v40  ;;  %v3376_v40 = vld [vmem:[#allocation5 + $0x448] ss:$16 sps:$4 sm:$0xff]  }
 0x106   :  { %1915 = vmatpush1.bf16.msra.mxu0 %v3352_v32 }
 0x107   :  { %1956 = vmatpush1.bf16.msra.mxu1 %v3355_v33  ;;  %1916 = vmatprep.subr.bf16.mxu0 %v3360_v34  ;;  %v3445_v33 = vld [vmem:[#allocation8 + $0x60] ss:$8 sps:$4 sm:$0xff]  }
 0x108   :  { %1957 = vmatprep.subr.bf16.mxu1 %v3363_v35 }
 0x10a   :  { %1917 = vmatpush1.bf16.msra.mxu0 %v3358_v36  ;;  %v3450_v36 = vld [vmem:[#allocation8 + $0x54] ss:$8 sps:$4 sm:$0xff]  }
 0x10b   :  { %1958 = vmatpush1.bf16.msra.mxu1 %v3361_v38  ;;  %1918 = vmatprep.subr.bf16.mxu0 %v3366_v39 }
 0x10c   :  { %1959 = vmatprep.subr.bf16.mxu1 %v3369_v8  ;;  %v3448_v8 = vld [vmem:[#allocation8 + $0x50] ss:$8 sps:$4 sm:$0xff]  }
 0x10e   :  { %1919 = vmatpush1.bf16.msra.mxu0 %v3364_v49 }
 0x10f   :  { %1960 = vmatpush1.bf16.msra.mxu1 %v3367_v9  ;;  %1920 = vmatprep.subr.bf16.mxu0 %v3372_v52  ;;  %v3453_v52 = vld [vmem:[#allocation8 + $0x44] ss:$8 sps:$4 sm:$0xff]  }
 0x110   :  { %1961 = vmatprep.subr.bf16.mxu1 %v3375_v41  ;;  %v3490_v41 = vld [vmem:[#allocation8 + $0x170] ss:$8 sps:$4 sm:$0xff]  }
 0x112   :  { %1921 = vmatpush1.bf16.msra.mxu0 %v3370_v42  ;;  %v3495_v42 = vld [vmem:[#allocation8 + $0x164] ss:$8 sps:$4 sm:$0xff]  }
 0x113   :  { %1962 = vmatpush1.bf16.msra.mxu1 %v3373_v43  ;;  %1922 = vmatprep.subr.bf16.mxu0 %v3378_v44  ;;  %v3493_v43 = vld [vmem:[#allocation8 + $0x160] ss:$8 sps:$4 sm:$0xff]   ;;  %v3456_v44 = vld [vmem:[#allocation8 + $0x34] ss:$8 sps:$4 sm:$0xff]  }
 0x114   :  { %1963 = vmatprep.subr.bf16.mxu1 %v3381_v37  ;;  %v3498_v37 = vld [vmem:[#allocation8 + $0x154] ss:$8 sps:$4 sm:$0xff]  }
 0x116   :  { %1923 = vmatpush1.bf16.msra.mxu0 %v3376_v40  ;;  %v3454_v40 = vld [vmem:[#allocation8 + $0x30] ss:$8 sps:$4 sm:$0xff]  }
 0x117   :  { %1964 = vmatpush1.bf16.msra.mxu1 %v3379_v45  ;;  %1924 = vmatprep.subr.bf16.mxu0 %v3384_v46  ;;  %v3496_v45 = vld [vmem:[#allocation8 + $0x150] ss:$8 sps:$4 sm:$0xff]   ;;  %v3459_v46 = vld [vmem:[#allocation8 + $0x24] ss:$8 sps:$4 sm:$0xff]  }
 0x118   :  { %1965 = vmatprep.subr.bf16.mxu1 %v3387_v47  ;;  %v3501_v47 = vld [vmem:[#allocation8 + $0x144] ss:$8 sps:$4 sm:$0xff]  }
 0x11a   :  { %1925 = vmatpush1.bf16.msra.mxu0 %v3382_v48  ;;  %v3457_v48 = vld [vmem:[#allocation8 + $0x20] ss:$8 sps:$4 sm:$0xff]  }
 0x11b   :  { %1966 = vmatpush1.bf16.msra.mxu1 %v3385_v50  ;;  %1926 = vmatprep.subr.bf16.mxu0 %v3390_v51  ;;  %v3499_v50 = vld [vmem:[#allocation8 + $0x140] ss:$8 sps:$4 sm:$0xff]   ;;  %v3462_v51 = vld [vmem:[#allocation8 + $0x14] ss:$8 sps:$4 sm:$0xff]  }
 0x11c   :  { %1967 = vmatprep.subr.bf16.mxu1 %v3393_v53  ;;  %v3504_v53 = vld [vmem:[#allocation8 + $0x134] ss:$8 sps:$4 sm:$0xff]  }
 0x11e   :  { %1927 = vmatpush1.bf16.msra.mxu0 %v3388_v54  ;;  %v3460_v54 = vld [vmem:[#allocation8 + $0x10] ss:$8 sps:$4 sm:$0xff]  }
 0x11f   :  { %1968 = vmatpush1.bf16.msra.mxu1 %v3391_v55  ;;  %1928 = vmatprep.subr.bf16.mxu0 %v3396_v56  ;;  %v3502_v55 = vld [vmem:[#allocation8 + $0x130] ss:$8 sps:$4 sm:$0xff]   ;;  %v3465_v56 = vld [vmem:[#allocation8 + $0x4] ss:$8 sps:$4 sm:$0xff]  }
 0x120   :  { %1969 = vmatprep.subr.bf16.mxu1 %v3399_v57  ;;  %v3507_v57 = vld [vmem:[#allocation8 + $0x124] ss:$8 sps:$4 sm:$0xff]  }
 0x122   :  { %1929 = vmatpush2.bf16.msra.mxu0 %v3394_v58  ;;  %v3463_v58 = vld [vmem:[#allocation8] ss:$8 sps:$4 sm:$0xff]  }
 0x123   :  { %1970 = vmatpush2.bf16.msra.mxu1 %v3397_v59  ;;  %1930 = vmatprep.subr.bf16.mxu0 %v3402_v60  ;;  %v3505_v59 = vld [vmem:[#allocation8 + $0x120] ss:$8 sps:$4 sm:$0xff]   ;;  %v3468_v60 = vld [vmem:[#allocation8 + $0xf4] ss:$8 sps:$4 sm:$0xff]  }
 0x124   :  { %1971 = vmatprep.subr.bf16.mxu1 %v3405_v61  ;;  %v3510_v61 = vld [vmem:[#allocation8 + $0x114] ss:$8 sps:$4 sm:$0xff]  }
 0x126   :  { %1931 = vmatpush2.bf16.msra.mxu0 %v3400_v62  ;;  %v3466_v62 = vld [vmem:[#allocation8 + $0xf0] ss:$8 sps:$4 sm:$0xff]  }
 0x127   :  { %1972 = vmatpush2.bf16.msra.mxu1 %v3403_v63  ;;  %1932 = vmatprep.subr.bf16.mxu0 %v3408_v0  ;;  %v3508_v63 = vld [vmem:[#allocation8 + $0x110] ss:$8 sps:$4 sm:$0xff]   ;;  %v3471_v0 = vld [vmem:[#allocation8 + $0xe4] ss:$8 sps:$4 sm:$0xff]  }
 0x128   :  { %1973 = vmatprep.subr.bf16.mxu1 %v3411_v1  ;;  %v3513_v1 = vld [vmem:[#allocation8 + $0x104] ss:$8 sps:$4 sm:$0xff]  }
 0x12a   :  { %1933 = vmatpush2.bf16.msra.mxu0 %v3406_v2  ;;  %v3469_v2 = vld [vmem:[#allocation8 + $0xe0] ss:$8 sps:$4 sm:$0xff]  }
 0x12b   :  { %1974 = vmatpush2.bf16.msra.mxu1 %v3409_v3  ;;  %1934 = vmatprep.subr.bf16.mxu0 %v3414_v4  ;;  %v3511_v3 = vld [vmem:[#allocation8 + $0x100] ss:$8 sps:$4 sm:$0xff]   ;;  %v3474_v4 = vld [vmem:[#allocation8 + $0xd4] ss:$8 sps:$4 sm:$0xff]  }
 0x12c   :  { %1975 = vmatprep.subr.bf16.mxu1 %v3417_v5  ;;  %v3516_v5 = vld [vmem:[#allocation8 + $0x1f4] ss:$8 sps:$4 sm:$0xff]  }
 0x12e   :  { %1935 = vmatpush2.bf16.msra.mxu0 %v3412_v6  ;;  %v3472_v6 = vld [vmem:[#allocation8 + $0xd0] ss:$8 sps:$4 sm:$0xff]  }
 0x12f   :  { %1976 = vmatpush2.bf16.msra.mxu1 %v3415_v7  ;;  %1936 = vmatprep.subr.bf16.mxu0 %v3420_v10  ;;  %v3514_v7 = vld [vmem:[#allocation8 + $0x1f0] ss:$8 sps:$4 sm:$0xff]   ;;  %v3477_v10 = vld [vmem:[#allocation8 + $0xc4] ss:$8 sps:$4 sm:$0xff]  }
 0x130   :  { %1977 = vmatprep.subr.bf16.mxu1 %v3423_v11  ;;  %v3519_v11 = vld [vmem:[#allocation8 + $0x1e4] ss:$8 sps:$4 sm:$0xff]  }
 0x132   :  { %1937 = vmatpush2.bf16.msra.mxu0 %v3418_v12  ;;  %v3475_v12 = vld [vmem:[#allocation8 + $0xc0] ss:$8 sps:$4 sm:$0xff]  }
 0x133   :  { %1978 = vmatpush2.bf16.msra.mxu1 %v3421_v13  ;;  %1938 = vmatprep.subr.bf16.mxu0 %v3426_v14  ;;  %v3517_v13 = vld [vmem:[#allocation8 + $0x1e0] ss:$8 sps:$4 sm:$0xff]   ;;  %v3480_v14 = vld [vmem:[#allocation8 + $0xb4] ss:$8 sps:$4 sm:$0xff]  }
 0x134   :  { %1979 = vmatprep.subr.bf16.mxu1 %v3429_v15  ;;  %v3522_v15 = vld [vmem:[#allocation8 + $0x1d4] ss:$8 sps:$4 sm:$0xff]  }
 0x136   :  { %1939 = vmatpush2.bf16.msra.mxu0 %v3424_v16  ;;  %v366_v16 = vlaneseq }
 0x137   :  { %1980 = vmatpush2.bf16.msra.mxu1 %v3427_v17  ;;  %1940 = vmatprep.subr.bf16.mxu0 %v3432_v18  ;;  %v3478_v17 = vld [vmem:[#allocation8 + $0xb0] ss:$8 sps:$4 sm:$0xff]  }
 0x138   :  { %1981 = vmatprep.subr.bf16.mxu1 %v3435_v19  ;;  %v3520_v18 = vld [vmem:[#allocation8 + $0x1d0] ss:$8 sps:$4 sm:$0xff]   ;;  %v3483_v19 = vld [vmem:[#allocation8 + $0xa4] ss:$8 sps:$4 sm:$0xff]  }
 0x13a   :  { %1941 = vmatpush2.bf16.msra.mxu0 %v3430_v22  ;;  %v3525_v22 = vld [vmem:[#allocation8 + $0x1c4] ss:$8 sps:$4 sm:$0xff]  }
 0x13b   :  { %1982 = vmatpush2.bf16.msra.mxu1 %v3433_v23  ;;  %1942 = vmatprep.subr.bf16.mxu0 %v3438_v24  ;;  %v3793_v23 = vshrl.u32 %v366_v16, 7  ;;  %v3481_v24 = vld [vmem:[#allocation8 + $0xa0] ss:$8 sps:$4 sm:$0xff]   ;;  %v3549_v16 = vld [vmem:[#allocation10 + $0x10] sm:$0xff]  }
 0x13c   :  { %1983 = vmatprep.subr.bf16.mxu1 %v3441_v25  ;;  %v3523_v25 = vld [vmem:[#allocation8 + $0x1c0] ss:$8 sps:$4 sm:$0xff]  }
 0x13e   :  { %1943 = vmatpush2.bf16.msra.mxu0 %v3436_v26  ;;  %v3486_v26 = vld [vmem:[#allocation8 + $0x94] ss:$8 sps:$4 sm:$0xff]  }
 0x13f   :  { %1984 = vmatpush2.bf16.msra.mxu1 %v3439_v27  ;;  %2398 = vmatprep.subr.bf16.mxu0 %v3444_v28  ;;  %v3528_v27 = vld [vmem:[#allocation8 + $0x1b4] ss:$8 sps:$4 sm:$0xff]   ;;  %v368_v28 = vsub.s32 0, %v3793_v23 }
 0x141   :  { %v3783_v31 = vpop.f32.mrf.mxu0  ;;  %1945 = vmatmul.mubr.bf16.vlgmr.msra.gmra.mxu0 %v3771_v20  ;;  %v3492_v20 = vld [vmem:[#allocation8 + $0x174] ss:$8 sps:$4 sm:$0xff]  }
 0x142   :  { %v3785_v32 = vpop.f32.mrf.mxu1  ;;  %1986 = vmatmul.mubr.bf16.vlgmr.msra.gmra.mxu1 %v3773_v21  ;;  %2399 = vmatpush1.bf16.msra.mxu0 %v3442_v29  ;;  %v3451_v21 = vld [vmem:[#allocation8 + $0x40] ss:$8 sps:$4 sm:$0xff]   ;;  %v3796_v29 = vld [vmem:[#allocation7] sm:$0xf] }
 0x143   :  { %v3789_v34 = vpop.f32.mrf.mxu0  ;;  %2400 = vmatprep.subr.bf16.mxu0 %v3447_v30  ;;  %2439 = vmatprep.subr.bf16.mxu1 %v3492_v20  ;;  %v372_v30 = vsub.s32 1, %v3793_v23 }
 0x144   :  { %v3791_v35 = vpop.f32.mrf.mxu1  ;;  %2440 = vmatpush1.bf16.msra.mxu1 %v3490_v41  ;;  %v3531_v41 = vld [vmem:[#allocation8 + $0x1a4] ss:$8 sps:$4 sm:$0xff]  }
 0x145   :  { %v1704_v38 = vpop.f32.mrf.mxu0  ;;  %2441 = vmatprep.subr.bf16.mxu1 %v3495_v42  ;;  %v3529_v42 = vld [vmem:[#allocation8 + $0x1a0] ss:$8 sps:$4 sm:$0xff]  }
 0x146   :  { %v1745_v39 = vpop.f32.mrf.mxu1  ;;  %2401 = vmatpush1.bf16.msra.mxu0 %v3445_v33  ;;  %v3484_v33 = vld [vmem:[#allocation8 + $0x90] ss:$8 sps:$4 sm:$0xff]   ;;  %v3489_v38 = vld [vmem:[#allocation8 + $0x84] ss:$8 sps:$4 sm:$0xff]  }
 0x147   :  { %v1705_v49 = vpop.f32.mrf.mxu0  ;;  %2402 = vmatprep.subr.bf16.mxu0 %v3450_v36  ;;  %v3526_v36 = vld [vmem:[#allocation8 + $0x1b0] ss:$8 sps:$4 sm:$0xff]   ;;  %v369_v39 = vrot.slane %v3796_v29, %v368_v28 }
 0x148   :  { %v1746_v9 = vpop.f32.mrf.mxu1  ;;  %2442 = vmatpush1.bf16.msra.mxu1 %v3493_v43  ;;  %v3487_v49 = vld [vmem:[#allocation8 + $0x80] ss:$8 sps:$4 sm:$0xff]  }
 0x149   :  { %2443 = vmatprep.subr.bf16.mxu1 %v3498_v37  ;;  %v1701_v9 = vadd.f32 %v3783_v31, %v369_v39  ;;  %v3532_v31 = vld [vmem:[#allocation8 + $0x190] ss:$8 sps:$4 sm:$0xff]  }
 0x14a   :  { %2403 = vmatpush1.bf16.msra.mxu0 %v3448_v8  ;;  %v373_v8 = vrot.slane %v3796_v29, %v372_v30 }
 0x14b   :  { %2404 = vmatprep.subr.bf16.mxu0 %v3453_v52  ;;  %v1742_v20 = vadd.f32 %v3785_v32, %v1701_v9 }
 0x14c   :  { %2444 = vmatpush1.bf16.msra.mxu1 %v3496_v45  ;;  %v1703_v52 = vadd.f32 %v3789_v34, %v373_v8 }
 0x14d   :  { %2445 = vmatprep.subr.bf16.mxu1 %v3501_v47 }
 0x14e   :  { %2405 = vmatpush1.bf16.msra.mxu0 %v3451_v21 }
 0x14f   :  { %2406 = vmatprep.subr.bf16.mxu0 %v3456_v44  ;;  %v1744_v44 = vadd.f32 %v3791_v35, %v1703_v52 }
 0x150   :  { %2446 = vmatpush1.bf16.msra.mxu1 %v3499_v50 }
 0x151   :  { %2447 = vmatprep.subr.bf16.mxu1 %v3504_v53 }
 0x152   :  { %2407 = vmatpush1.bf16.msra.mxu0 %v3454_v40 }
 0x153   :  { %2408 = vmatprep.subr.bf16.mxu0 %v3459_v46  ;;  %v3534_v46 = vld [vmem:[#allocation8 + $0x194] ss:$8 sps:$4 sm:$0xff]  }
 0x154   :  { %2448 = vmatpush1.bf16.msra.mxu1 %v3502_v55  ;;  %v3537_v55 = vld [vmem:[#allocation8 + $0x184] ss:$8 sps:$4 sm:$0xff]  }
 0x155   :  { %2449 = vmatprep.subr.bf16.mxu1 %v3507_v57  ;;  %v3535_v57 = vld [vmem:[#allocation8 + $0x180] ss:$8 sps:$4 sm:$0xff]  }
 0x156   :  { %2409 = vmatpush1.bf16.msra.mxu0 %v3457_v48 }
 0x157   :  { %2410 = vmatprep.subr.bf16.mxu0 %v3462_v51 }
 0x158   :  { %2450 = vmatpush1.bf16.msra.mxu1 %v3505_v59 }
 0x159   :  { %2451 = vmatprep.subr.bf16.mxu1 %v3510_v61 }
 0x15a   :  { %2411 = vmatpush1.bf16.msra.mxu0 %v3460_v54 }
 0x15b   :  { %2412 = vmatprep.subr.bf16.mxu0 %v3465_v56 }
 0x15c   :  { %2452 = vmatpush1.bf16.msra.mxu1 %v3508_v63 }
 0x15d   :  { %2453 = vmatprep.subr.bf16.mxu1 %v3513_v1 }
 0x15e   :  { %2413 = vmatpush1.bf16.msra.mxu0 %v3463_v58 }
 0x15f   :  { %2414 = vmatprep.subr.bf16.mxu0 %v3468_v60 }
 0x160   :  { %2454 = vmatpush1.bf16.msra.mxu1 %v3511_v3  ;;  %v3538_v3 = vld [vmem:[#allocation10 + $0x78] sm:$0xff]  }
 0x161   :  { %2455 = vmatprep.subr.bf16.mxu1 %v3516_v5  ;;  %v3540_v5 = vld [vmem:[#allocation10 + $0x70] sm:$0xff]  }
 0x162   :  { %2415 = vmatpush2.bf16.msra.mxu0 %v3466_v62 }
 0x163   :  { %2416 = vmatprep.subr.bf16.mxu0 %v3471_v0 }
 0x164   :  { %2456 = vmatpush2.bf16.msra.mxu1 %v3514_v7  ;;  %v3542_v7 = vld [vmem:[#allocation10 + $0x68] sm:$0xff]  }
 0x165   :  { %2457 = vmatprep.subr.bf16.mxu1 %v3519_v11  ;;  %v3544_v11 = vld [vmem:[#allocation10 + $0x60] sm:$0xff]  }
 0x166   :  { %2417 = vmatpush2.bf16.msra.mxu0 %v3469_v2 }
 0x167   :  { %2418 = vmatprep.subr.bf16.mxu0 %v3474_v4  ;;  %v3539_v4 = vld [vmem:[#allocation10 + $0x38] sm:$0xff]  }
 0x168   :  { %2458 = vmatpush2.bf16.msra.mxu1 %v3517_v13  ;;  %v3546_v13 = vld [vmem:[#allocation10 + $0x58] sm:$0xff]  }
 0x169   :  { %2459 = vmatprep.subr.bf16.mxu1 %v3522_v15  ;;  %v3548_v15 = vld [vmem:[#allocation10 + $0x50] sm:$0xff]  }
 0x16a   :  { %2419 = vmatpush2.bf16.msra.mxu0 %v3472_v6  ;;  %v3541_v6 = vld [vmem:[#allocation10 + $0x30] sm:$0xff]  }
 0x16b   :  { %2420 = vmatprep.subr.bf16.mxu0 %v3477_v10  ;;  %v3543_v10 = vld [vmem:[#allocation10 + $0x28] sm:$0xff]  }
 0x16c   :  { %2460 = vmatpush2.bf16.msra.mxu1 %v3520_v18  ;;  %v380_v18 = vsub.s32 3, %v3793_v23 }
 0x16d   :  { %2461 = vmatprep.subr.bf16.mxu1 %v3525_v22 }
 0x16e   :  { %2421 = vmatpush2.bf16.msra.mxu0 %v3475_v12  ;;  %v3545_v12 = vld [vmem:[#allocation10 + $0x20] sm:$0xff]   ;;  %v381_v22 = vrot.slane %v3796_v29, %v380_v18 }
 0x16f   :  { %2422 = vmatprep.subr.bf16.mxu0 %v3480_v14  ;;  %v3547_v14 = vld [vmem:[#allocation10 + $0x18] sm:$0xff]  }
 0x170   :  { %2462 = vmatpush2.bf16.msra.mxu1 %v3523_v25 }
 0x171   :  { %2463 = vmatprep.subr.bf16.mxu1 %v3528_v27 }
 0x172   :  { %2423 = vmatpush2.bf16.msra.mxu0 %v3478_v17  ;;  %v376_v17 = vsub.s32 2, %v3793_v23  ;;  %v3007_v23 = vld [vmem:[%s3832_s6] ss:$0 sm:$0xff]  ;;  %s3658_s6 = scalar_lea.vmem %s2677_s8, 128 }
 0x173   :  { %2424 = vmatprep.subr.bf16.mxu0 %v3483_v19  ;;  %p3659_p11 = scmp.ne.s32.totalorder %s2677_s8, %s3658_s6  ;;  %p3664_p13 = scmp.lt.s32.totalorder %s3658_s6, %s3658_s6 }
 0x174   :  { %2464 = vmatpush2.bf16.msra.mxu1 %v3526_v36  ;;  %v377_v19 = vrot.slane %v3796_v29, %v376_v17 }
 0x175   :  { %2465 = vmatprep.subr.bf16.mxu1 %v3531_v41  ;;  %p3665_p0 = por %p3664_p13, %p3663_p12 }
 0x176   :  { %2425 = vmatpush2.bf16.msra.mxu0 %v3481_v24 }
 0x177   :  { %2426 = vmatprep.subr.bf16.mxu0 %v3486_v26  ;;  %p3666_p1 = pnand %p3665_p0, %p3659_p11 }
 0x178   :  { %2466 = vmatpush2.bf16.msra.mxu1 %v3529_v42 }
 0x179   :  { %2467 = vmatprep.subr.bf16.mxu1 %v3534_v46  ;;  %v3551_v46 = vld [vmem:[#allocation10 + $0x8] sm:$0xff]  }
 0x17a   :  { %2427 = vmatpush2.bf16.msra.mxu0 %v3484_v33 }
 0x17b   :  { %2428 = vmatprep.subr.bf16.mxu0 %v3489_v38 }
 0x17c   :  { %2468 = vmatpush2.bf16.msra.mxu1 %v3532_v31  ;;  %v3552_v31 = vld [vmem:[#allocation10 + $0x40] sm:$0xff]  }
 0x17d   :  { %2469 = vmatprep.subr.bf16.mxu1 %v3537_v55 }
 0x17e   :  { %2429 = vmatpush2.bf16.msra.mxu0 %v3487_v49 }
 0x17f   :  { %3024 = vmatprep.subr.bf16.mxu0 %v3538_v3 }
 0x180   :  { %2470 = vmatpush2.bf16.msra.mxu1 %v3535_v57 }
 0x181   :  { %v1782_v21 = vpop.f32.mrf.mxu0 }
 0x182   :  { %v1823_v43 = vpop.f32.mrf.mxu1  ;;  %v1783_v37 = vadd.f32 %v1782_v21, %v1742_v20 }
 0x183   :  { %v1784_v40 = vpop.f32.mrf.mxu0 }
 0x184   :  { %v1825_v45 = vpop.f32.mrf.mxu1  ;;  %v1824_v47 = vadd.f32 %v1823_v43, %v1783_v37  ;;  %v1785_v48 = vadd.f32 %v1784_v40, %v1744_v44 }
 0x185   :  { %v1786_v50 = vpop.f32.mrf.mxu0 }
 0x186   :  { %v1827_v34 = vpop.f32.mrf.mxu1  ;;  %v1826_v51 = vadd.f32 %v1825_v45, %v1785_v48  ;;  %v1994_v32 = vmax.f32 %v1824_v47, 0.0  ;;  %v3550_v45 = vld [vmem:[#allocation10 + $0x48] sm:$0xff]   ;;  %v3553_v50 = vld [vmem:[#allocation10] sm:$0xff]  }
 0x187   :  { %v1787_v53 = vpop.f32.mrf.mxu0 }
 0x188   :  { %v1828_v54 = vpop.f32.mrf.mxu1  ;;  %v1995_v56 = vmax.f32 %v1826_v51, 0.0  ;;  %v1998_v58 = vpack.c.bf16 %v1994_v32, %v1994_v32  ;;  %v2066_v51 = vld [vmem:[%s3830_s4] sm:$0x3] }
 0x189   :  { %v2071_v32 = vrot.slane %v2066_v51, %v368_v28  ;;  %v2075_v53 = vrot.slane %v2066_v51, %v372_v30 }
 0x18a   :  { %v1999_v35 = vpack.c.bf16 %v1995_v56, %v1995_v56 }
 0x18c   :  { %2430 = vmatprep.mubr.bf16.mxu0 %v1999_v35 }
 0x18d   :  { %2431 = vmatmul.mubr.bf16.vlgmr.msra.gmra.mxu0 %v1998_v58 }
 0x18e   :  { %3025 = vmatpush3.bf16.msra.mxu0 %v3539_v4 }
 0x18f   :  { %3026 = vmatprep.subr.bf16.mxu0 %v3540_v5 }
 0x192   :  { %3027 = vmatpush3.bf16.msra.mxu0 %v3541_v6 }
 0x193   :  { %3028 = vmatprep.subr.bf16.mxu0 %v3542_v7 }
 0x196   :  { %3029 = vmatpush3.bf16.msra.mxu0 %v3543_v10 }
 0x197   :  { %3030 = vmatprep.subr.bf16.mxu0 %v3544_v11 }
 0x19a   :  { %3031 = vmatpush3.bf16.msra.mxu0 %v3545_v12 }
 0x19b   :  { %3032 = vmatprep.subr.bf16.mxu0 %v3546_v13 }
 0x19e   :  { %3033 = vmatpush3.bf16.msra.mxu0 %v3547_v14 }
 0x19f   :  { %3034 = vmatprep.subr.bf16.mxu0 %v3548_v15 }
 0x1a2   :  { %3035 = vmatpush3.bf16.msra.mxu0 %v3549_v16 }
 0x1a3   :  { %3036 = vmatprep.subr.bf16.mxu0 %v3550_v45 }
 0x1a6   :  { %3037 = vmatpush3.bf16.msra.mxu0 %v3551_v46 }
 0x1a7   :  { %3038 = vmatprep.subr.bf16.mxu0 %v3552_v31 }
 0x1aa   :  { %3039 = vmatpush3.bf16.msra.mxu0 %v3553_v50 }
 0x1c1   :  { %v1864_v59 = vpop.f32.mrf.mxu0 }
 0x1c2   :  { %v1905_v60 = vpop.f32.mrf.mxu1  ;;  %v1865_v24 = vadd.f32 %v1864_v59, %v377_v19 }
 0x1c3   :  { %v1866_v61 = vpop.f32.mrf.mxu0 }
 0x1c4   :  { %v1907_v62 = vpop.f32.mrf.mxu1  ;;  %v1867_v25 = vadd.f32 %v1866_v61, %v381_v22  ;;  %v1906_v26 = vadd.f32 %v1905_v60, %v1865_v24 }
 0x1c5   :  { %v1868_v63 = vpop.f32.mrf.mxu0 }
 0x1c6   :  { %v1909_v0 = vpop.f32.mrf.mxu1  ;;  %v1908_v36 = vadd.f32 %v1907_v62, %v1867_v25 }
 0x1c7   :  { %v1869_v1 = vpop.f32.mrf.mxu0 }
 0x1c8   :  { %v1910_v2 = vpop.f32.mrf.mxu1 }
 0x201   :  { %v1946_v27 = vpop.f32.mrf.mxu0 }
 0x202   :  { %v1987_v33 = vpop.f32.mrf.mxu1  ;;  %v1947_v38 = vadd.f32 %v1946_v27, %v1906_v26 }
 0x203   :  { %v1948_v39 = vpop.f32.mrf.mxu0 }
 0x204   :  { %v1989_v8 = vpop.f32.mrf.mxu1  ;;  %v1988_v49 = vadd.f32 %v1987_v33, %v1947_v38  ;;  %v1949_v9 = vadd.f32 %v1948_v39, %v1908_v36 }
 0x205   :  { %v1950_v52 = vpop.f32.mrf.mxu0 }
 0x206   :  { %v1991_v41 = vpop.f32.mrf.mxu1  ;;  %v1990_v20 = vadd.f32 %v1989_v8, %v1949_v9  ;;  %v1996_v42 = vmax.f32 %v1988_v49, 0.0 }
 0x207   :  { %v1951_v21 = vpop.f32.mrf.mxu0 }
 0x208   :  { %v1992_v43 = vpop.f32.mrf.mxu1  ;;  %v1997_v44 = vmax.f32 %v1990_v20, 0.0  ;;  %v2000_v29 = vpack.c.bf16 %v1996_v42, %v1996_v42 }
 0x20a   :  { %v2001_v37 = vpack.c.bf16 %v1997_v44, %v1997_v44 }
 0x20c   :  { %2471 = vmatprep.mubr.bf16.mxu1 %v2001_v37 }
 0x20d   :  { %2472 = vmatmul.mubr.bf16.vlgmr.msra.gmra.mxu1 %v2000_v29 }
 0x24d   :  { %v2432_v40 = vpop.f32.mrf.mxu0 }
 0x24e   :  { %v2433_v54 = vadd.f32 %v2432_v40, %v2071_v32 }
 0x24f   :  { %v2434_v47 = vpop.f32.mrf.mxu0 }
 0x250   :  { %v2435_v56 = vadd.f32 %v2434_v47, %v2075_v53 }
 0x251   :  { %v2436_v48 = vpop.f32.mrf.mxu0 }
 0x253   :  { %v2437_v34 = vpop.f32.mrf.mxu0 }
 0x2cd   :  { %v2473_v55 = vpop.f32.mrf.mxu1 }
 0x2ce   :  { %v2474_v57 = vadd.f32 %v2473_v55, %v2433_v54 }
 0x2cf   :  { %v2475_v35 = vpop.f32.mrf.mxu1 }
 0x2d0   :  { %v2476_v58 = vadd.f32 %v2475_v35, %v2435_v56  ;;  %v2480_v59 = vmax.f32 %v2474_v57, 0.0 }
 0x2d1   :  { %v2477_v60 = vpop.f32.mrf.mxu1 }
 0x2d2   :  { %v2481_v61 = vmax.f32 %v2476_v58, 0.0  ;;  %v2482_v0 = vpack.c.bf16 %v2480_v59, %v2480_v59 }
 0x2d3   :  { %v2478_v62 = vpop.f32.mrf.mxu1 }
 0x2d4   :  { %v2483_v63 = vpack.c.bf16 %v2481_v61, %v2481_v61 }
 0x2d6   :  { %2651 = vmatprep.mubr.bf16.mxu0 %v2483_v63 }
 0x2d7   :  { %2652 = vmatmul.mubr.bf16.vlgmr.msra.gmra.mxu0 %v2482_v0 }
 0x397   :  { %v3040_v1 = vpop.f32.mrf.mxu0 }
 0x399   :  { %v3041_v2 = vpop.f32.mrf.mxu0 }
 0x39a   :  { %v3042_v28 = vadd.f32 %v3041_v2, %v3040_v1 }
 0x39b   :  { %v3043_v30 = vpop.f32.mrf.mxu0 }
 0x39c   :  { %v2654_v3 = vadd.f32 %v3042_v28, %v3007_v23 }
 0x39d   :  { %v3044_v4 = vpop.f32.mrf.mxu0 }
 0x39e   :  { %2659 = vmax.xlane.f32.xlu0 %v2654_v3 }
 0x427   :  { %v2660_v5 = vpop.xlane.xlu0 %2659 }
 0x428   :  { %v2661_v6 = vsub.f32 %v2654_v3, %v2660_v5 }
 0x42a   :  { %v2662_v7 = vmul.f32 1.442695, %v2661_v6 }
 0x42c   :  { %3554 = vpow2.f32 %v2662_v7 }
 0x439   :  { %v3555_v10 = vpop.eup %3554 }
 0x43a   :  { %2664 = vadd.xlane.f32.xlu0 %v3555_v10 }
 0x4c3   :  { %v2665_v11 = vpop.xlane.xlu0 %2664 }
 0x4c4   :  { %3556 = vlog2.f32 %v2665_v11 }
 0x4d1   :  { %v3557_v12 = vpop.eup %3556 }
 0x4d2   :  { %v2667_v13 = vmul.f32 0.6931472, %v3557_v12 }
 0x4d4   :  { %v2668_v14 = vsub.f32 %v2661_v6, %v2667_v13 }
 0x4d6   :  { %2669 = vst [vmem:[#allocation11] sm:$0xff] %v2668_v14 }
 0x4d7   :  { %3669 = shalt.err (!%p3666_p1)
}
 0x4d8   :  { %2679 = dma.vmem_to_hbm [thread:$0]  %s2677_s8, 128, %s3833_s7, [#allocation4]  }
 0x4d9   :  { %3684 = dma.done.wait [#allocation4], 128  }
 0x4da   :  { %3685 = vsyncadd [#allocation4], 4294967168 }
 0x4db   :  { %2683 = vsyncpa [#allocation3], 1 }
 0x4dc   :  { %2684 = vsyncpa [#allocation6], 1 }
 0x4dd   :  { %2685 = vsyncpa [#allocation9], 1 }
 0x4de   :  { %2686 = vsyncpa [#allocation4], 1 }

</bundles_post_ra>
